<compile_context>
chip_gen: v6e
topology: v6e:2x2x1
jax: 0.10.0
libtpu: 0.0.40
codegen_flags: <defaults>
</compile_context>

<pallas_src>
import functools
import math

import jax
import jax.numpy as jnp
from jax import lax
from jax.experimental import pallas as pl
from jax.experimental.pallas import tpu as pltpu

NUM_HEADS = 4
MAX_SEQ_LEN = 8
DROPOUT_PROB = 0.1  # inference: dropout is identity


# ------------------------------ fused kernel --------------------------------

def _rpe_mha_kernel(xq_ref, xk_ref, xv_ref,
                    wq_ref, bq_ref, wk_ref, bk_ref, wv_ref, bv_ref,
                    er_t_ref, wo_ref, bo_ref,
                    o_ref,
                    *, n_head, seq_len, d_head, scale):
  """One batch element per grid step; all heads packed along sublanes."""
  H, S, Dh = n_head, seq_len, d_head
  L = S
  HS = H * S
  f32 = jnp.float32

  xq = xq_ref[...]                  # (S, D)
  xk = xk_ref[...]
  xv = xv_ref[...]

  # --- per-head projections with host-pre-sliced weights ---------------------
  # (S, D) @ (D, Dh) -> (S, Dh): output is already the head slice, no lane
  # sub-slicing of activations needed.  nn.Dropout is identity at inference.
  q_heads, k_heads, v_heads = [], [], []
  for h in range(H):
    q_heads.append(jnp.dot(xq, wq_ref[h], preferred_element_type=f32)
                   + bq_ref[h])
    k_heads.append(jnp.dot(xk, wk_ref[h], preferred_element_type=f32)
                   + bk_ref[h])
    v_heads.append(jnp.dot(xv, wv_ref[h], preferred_element_type=f32)
                   + bv_ref[h])
  # Rows ordered (h, s); S is a multiple of 8 so these are aligned sublane
  # concatenations.
  q_all = jnp.concatenate(q_heads, axis=0) * scale      # (HS, Dh), pre-scaled
  k_all = jnp.concatenate(k_heads, axis=0)              # (HS, Dh)
  v_all = jnp.concatenate(v_heads, axis=0)              # (HS, Dh)

  # --- block-diagonal attention scores for all heads at once -----------------
  att = lax.dot_general(q_all, k_all, (((1,), (1,)), ((), ())),
                        preferred_element_type=f32)     # (HS, HS)

  # --- relative-position term (the _skew trick) -------------------------------
  qer = jnp.dot(q_all, er_t_ref[...], preferred_element_type=f32)   # (HS, L)

  # In-kernel mask / diagonal selector (no HBM tables).  Rows/cols are ordered
  # (h, s); same head-block <=> same high bits; i - j picks the skew diagonal.
  row = lax.broadcasted_iota(jnp.int32, (HS, HS), 0)
  col = lax.broadcasted_iota(jnp.int32, (HS, HS), 1)
  if (S & (S - 1)) == 0:            # power-of-two fast path (shifts, no div)
    sh = S.bit_length() - 1
    same = (row >> sh) == (col >> sh)
    diff = (row & (S - 1)) - (col & (S - 1))
  else:
    same = (row // S) == (col // S)
    diff = (row % S) - (col % S)
  # srel[i, j] = qer[i, L-1-(i-j)] for i >= j (within a head block), else 0.
  # For i < j, (S-1)-diff >= S never matches l in [0, L-1]; off-block is -1.
  dsel = jnp.where(same, (S - 1) - diff, -1)

  att = jnp.where(same, att, -1e30)                     # kill off-block scores
  for l in range(L):                                    # accumulate diagonals
    att = att + jnp.where(dsel == l, qer[:, l:l + 1], 0.0)

  # --- softmax with deferred normalization -----------------------------------
  m = jnp.max(att, axis=-1, keepdims=True)
  p = jnp.exp(att - m)                                  # off-block -> 0 (f32)
  denom = jnp.sum(p, axis=-1, keepdims=True)            # (HS, 1)
  out_all = jnp.dot(p, v_all, preferred_element_type=f32)           # (HS, Dh)
  out_all = out_all * pl.reciprocal(denom, approx=False)

  # --- head-merge fused into the output projection ---------------------------
  # merged @ Wo^T == sum_h out_head_h @ Wo^T[h*Dh:(h+1)*Dh, :]
  acc = jnp.dot(out_all[0:S, :], wo_ref[0], preferred_element_type=f32)
  for h in range(1, H):
    acc = acc + jnp.dot(out_all[h * S:(h + 1) * S, :], wo_ref[h],
                        preferred_element_type=f32)
  o_ref[...] = (acc + bo_ref[...]).astype(o_ref.dtype)


# ------------------------------ module wrapper -------------------------------

def init_params(key, d_model, n_head, max_seq_len):
  d_head = d_model // n_head
  keys = jax.random.split(key, 9)
  bound = 1.0 / math.sqrt(d_model)

  def lin(kw, kb):
    w = jax.random.uniform(kw, (d_model, d_model), jnp.float32, -bound, bound)
    b = jax.random.uniform(kb, (d_model,), jnp.float32, -bound, bound)
    return w, b

  return {
      "q": lin(keys[0], keys[1]),
      "k": lin(keys[2], keys[3]),
      "v": lin(keys[4], keys[5]),
      "o": lin(keys[6], keys[7]),
      # Er ~ torch.rand(max_seq_len, d_head)
      "Er": jax.random.uniform(keys[8], (max_seq_len, d_head), jnp.float32,
                               0.0, 1.0),
  }


def rpe_mha_forward(params, query, key, value, n_head):
  B, S, D = query.shape
  H = n_head
  Dh = D // H
  scale = 1.0 / math.sqrt(Dh)
  wq, bq = params["q"]
  wk, bk = params["k"]
  wv, bv = params["v"]
  wo, bo = params["o"]
  Er = params["Er"]
  L = Er.shape[0]
  assert S == L, "seq_len must equal max_seq_len (required by _skew broadcast)"
  assert S % 8 == 0 or B == 1, "per-batch (S, D) blocks need S % 8 == 0"

  # Host-side weight re-layout: per-head slices so the kernel never lane-slices.
  def head_wt(w):                   # (D, D) Linear weight -> (H, D, Dh), W_h^T
    return jnp.transpose(w.reshape(H, Dh, D), (0, 2, 1))

  def head_b(b):                    # (D,) -> (H, 1, Dh)
    return b.reshape(H, 1, Dh)

  wq_h, wk_h, wv_h = head_wt(wq), head_wt(wk), head_wt(wv)
  bq_h, bk_h, bv_h = head_b(bq), head_b(bk), head_b(bv)
  wo_h = wo.T.reshape(H, Dh, D)     # Wo^T row-blocks per head
  bo2 = bo.reshape(1, D)
  er_t = Er.T                       # (Dh, L)

  HS = H * S
  flops = 2 * B * (3 * S * D * D          # q/k/v projections
                   + HS * Dh * HS         # q @ k^T (block-diagonal)
                   + HS * Dh * L          # q @ Er^T
                   + HS * HS * Dh         # p @ v
                   + S * D * D)           # output projection
  bytes_accessed = 4 * (4 * B * S * D + 4 * D * D + 4 * D + L * Dh)

  kern = functools.partial(_rpe_mha_kernel, n_head=H, seq_len=S, d_head=Dh,
                           scale=scale)

  act_spec = pl.BlockSpec((S, D), lambda b: (b, 0))
  w_spec = pl.BlockSpec((H, D, Dh), lambda b: (0, 0, 0))
  b_spec = pl.BlockSpec((H, 1, Dh), lambda b: (0, 0, 0))
  er_spec = pl.BlockSpec((Dh, L), lambda b: (0, 0))
  wo_spec = pl.BlockSpec((H, Dh, D), lambda b: (0, 0, 0))
  bo_spec = pl.BlockSpec((1, D), lambda b: (0, 0))

  out2d = pl.pallas_call(
      kern,
      grid=(B,),
      in_specs=[act_spec, act_spec, act_spec,
                w_spec, b_spec, w_spec, b_spec, w_spec, b_spec,
                er_spec, wo_spec, bo_spec],
      out_specs=act_spec,
      out_shape=jax.ShapeDtypeStruct((B * S, D), query.dtype),
      compiler_params=pltpu.CompilerParams(
          dimension_semantics=("parallel",)),
      cost_estimate=pl.CostEstimate(flops=flops,
                                    transcendentals=B * HS * HS,
                                    bytes_accessed=bytes_accessed),
  )(query.reshape(B * S, D), key.reshape(B * S, D), value.reshape(B * S, D),
    wq_h, bq_h, wk_h, bk_h, wv_h, bv_h, er_t, wo_h, bo2)
  return out2d.reshape(B, S, D)


# ------------------- pure-JAX reference (exact PyTorch math) -----------------

def rpe_mha_reference(params, query, key, value, n_head):
  P = lax.Precision.HIGHEST
  B, S, D = query.shape
  d_head = D // n_head
  wq, bq = params["q"]
  wk, bk = params["k"]
  wv, bv = params["v"]
  wo, bo = params["o"]
  Er = params["Er"]
  L = Er.shape[0]

  q = jnp.dot(query, wq.T, precision=P) + bq
  k = jnp.dot(key, wk.T, precision=P) + bk
  v = jnp.dot(value, wv.T, precision=P) + bv
  q = q * (1.0 / math.sqrt(d_head))

  def split(x):
    return (jnp.transpose(x, (1, 0, 2))
              .reshape(S, B * n_head, d_head)
              .transpose(1, 0, 2))

  q, k, v = split(q), split(k), split(v)
  att = jnp.einsum('bse,bte->bst', q, k, precision=P)
  qer = jnp.einsum('bse,te->bst', q, Er, precision=P)
  mask = jnp.flip(jnp.triu(jnp.ones((L, L), jnp.float32)), axis=0)
  qer = mask * qer
  qer = jnp.pad(qer, ((0, 0), (0, 0), (1, 0)))
  qer = qer.reshape(qer.shape[0], qer.shape[2], qer.shape[1])
  srel = qer[:, 1:, :]
  att = att + srel
  att = jax.nn.softmax(att, axis=-1)
  out = jnp.einsum('bst,bte->bse', att, v, precision=P)
  out = jnp.transpose(out, (1, 0, 2)).reshape(S, B, D).transpose(1, 0, 2)
  return jnp.dot(out, wo.T, precision=P) + bo


# ------------------------------------ main -----------------------------------

if __name__ == "__main__":
  d_model = 32
  n_head = NUM_HEADS
  seq_len = MAX_SEQ_LEN          # seq_len == max_seq_len
  batch = 2

  root = jax.random.PRNGKey(0)
  kp, kq, kk, kv = jax.random.split(root, 4)
  params = init_params(kp, d_model, n_head, seq_len)
  query = jax.random.normal(kq, (batch, seq_len, d_model), jnp.float32)
  key_in = jax.random.normal(kk, (batch, seq_len, d_model), jnp.float32)
  value = jax.random.normal(kv, (batch, seq_len, d_model), jnp.float32)

  out = rpe_mha_forward(params, query, key_in, value, n_head)
  out = jax.block_until_ready(out)
  assert out.shape == (batch, seq_len, d_model)

  ref = jax.block_until_ready(
      rpe_mha_reference(params, query, key_in, value, n_head))

  max_err = float(jnp.max(jnp.abs(out - ref)))
  rel_err = max_err / (float(jnp.max(jnp.abs(ref))) + 1e-12)
  assert max_err < 1e-4, (
      f"mismatch vs reference: max abs err = {max_err:.3e}, rel = {rel_err:.3e}")

  print("KERNEL_OK")
</pallas_src>

<mosaic_0001>
module attributes {stable_mosaic.version = 11 : i64} {
  func.func @_rpe_mha_kernel(%arg0: i32, %arg1: memref<8x32xf32, #tpu.memory_space<vmem>>, %arg2: memref<8x32xf32, #tpu.memory_space<vmem>>, %arg3: memref<8x32xf32, #tpu.memory_space<vmem>>, %arg4: memref<4x32x8xf32, #tpu.memory_space<vmem>>, %arg5: memref<4x1x8xf32, #tpu.memory_space<vmem>>, %arg6: memref<4x32x8xf32, #tpu.memory_space<vmem>>, %arg7: memref<4x1x8xf32, #tpu.memory_space<vmem>>, %arg8: memref<4x32x8xf32, #tpu.memory_space<vmem>>, %arg9: memref<4x1x8xf32, #tpu.memory_space<vmem>>, %arg10: memref<8x8xf32, #tpu.memory_space<vmem>>, %arg11: memref<4x8x32xf32, #tpu.memory_space<vmem>>, %arg12: memref<1x32xf32, #tpu.memory_space<vmem>>, %arg13: memref<8x32xf32, #tpu.memory_space<vmem>>) attributes {dimension_semantics = [#tpu.dimension_semantics<parallel>], iteration_bounds = array<i64: 2>, scalar_prefetch = 0 : i64, scratch_operands = 0 : i64, tpu.core_type = #tpu.core_type<tc>, window_params = [{transform_indices = @transform_0, window_bounds = array<i64: 8, 32>}, {transform_indices = @transform_1, window_bounds = array<i64: 8, 32>}, {transform_indices = @transform_2, window_bounds = array<i64: 8, 32>}, {pipeline_mode = #tpu.pipeline_mode<synchronous>, transform_indices = @transform_3, window_bounds = array<i64: 4, 32, 8>}, {pipeline_mode = #tpu.pipeline_mode<synchronous>, transform_indices = @transform_4, window_bounds = array<i64: 4, 1, 8>}, {pipeline_mode = #tpu.pipeline_mode<synchronous>, transform_indices = @transform_5, window_bounds = array<i64: 4, 32, 8>}, {pipeline_mode = #tpu.pipeline_mode<synchronous>, transform_indices = @transform_6, window_bounds = array<i64: 4, 1, 8>}, {pipeline_mode = #tpu.pipeline_mode<synchronous>, transform_indices = @transform_7, window_bounds = array<i64: 4, 32, 8>}, {pipeline_mode = #tpu.pipeline_mode<synchronous>, transform_indices = @transform_8, window_bounds = array<i64: 4, 1, 8>}, {pipeline_mode = #tpu.pipeline_mode<synchronous>, transform_indices = @transform_9, window_bounds = array<i64: 8, 8>}, {pipeline_mode = #tpu.pipeline_mode<synchronous>, transform_indices = @transform_10, window_bounds = array<i64: 4, 8, 32>}, {pipeline_mode = #tpu.pipeline_mode<synchronous>, transform_indices = @transform_11, window_bounds = array<i64: 1, 32>}, {transform_indices = @transform_12, window_bounds = array<i64: 8, 32>}]} {
    %c0 = arith.constant 0 : index
    %c0_0 = arith.constant 0 : index
    %0 = vector.load %arg1[%c0, %c0_0] : memref<8x32xf32, #tpu.memory_space<vmem>>, vector<8x32xf32>
    %c0_1 = arith.constant 0 : index
    %c0_2 = arith.constant 0 : index
    %1 = vector.load %arg2[%c0_1, %c0_2] : memref<8x32xf32, #tpu.memory_space<vmem>>, vector<8x32xf32>
    %c0_3 = arith.constant 0 : index
    %c0_4 = arith.constant 0 : index
    %2 = vector.load %arg3[%c0_3, %c0_4] : memref<8x32xf32, #tpu.memory_space<vmem>>, vector<8x32xf32>
    %c0_5 = arith.constant 0 : index
    %c0_6 = arith.constant 0 : index
    %c0_7 = arith.constant 0 : index
    %3 = vector.load %arg4[%c0_5, %c0_6, %c0_7] : memref<4x32x8xf32, #tpu.memory_space<vmem>>, vector<1x32x8xf32>
    %4 = vector.shape_cast %3 : vector<1x32x8xf32> to vector<32x8xf32>
    %cst = arith.constant dense<0.000000e+00> : vector<8x8xf32>
    %5 = tpu.matmul %0, %4, %cst {dimension_numbers = #tpu.dot_dimension_numbers<[1], [0], [0], [1], [0, 0, 1, 1], [], []>} : vector<8x32xf32>, vector<32x8xf32>, vector<8x8xf32> -> vector<8x8xf32>
    %c0_8 = arith.constant 0 : index
    %c0_9 = arith.constant 0 : index
    %c0_10 = arith.constant 0 : index
    %6 = vector.load %arg5[%c0_8, %c0_9, %c0_10] : memref<4x1x8xf32, #tpu.memory_space<vmem>>, vector<1x1x8xf32>
    %7 = vector.shape_cast %6 : vector<1x1x8xf32> to vector<1x8xf32>
    %8 = vector.broadcast %7 : vector<1x8xf32> to vector<8x8xf32>
    %9 = arith.addf %5, %8 : vector<8x8xf32>
    %c0_11 = arith.constant 0 : index
    %c0_12 = arith.constant 0 : index
    %c0_13 = arith.constant 0 : index
    %10 = vector.load %arg6[%c0_11, %c0_12, %c0_13] : memref<4x32x8xf32, #tpu.memory_space<vmem>>, vector<1x32x8xf32>
    %11 = vector.shape_cast %10 : vector<1x32x8xf32> to vector<32x8xf32>
    %cst_14 = arith.constant dense<0.000000e+00> : vector<8x8xf32>
    %12 = tpu.matmul %1, %11, %cst_14 {dimension_numbers = #tpu.dot_dimension_numbers<[1], [0], [0], [1], [0, 0, 1, 1], [], []>} : vector<8x32xf32>, vector<32x8xf32>, vector<8x8xf32> -> vector<8x8xf32>
    %c0_15 = arith.constant 0 : index
    %c0_16 = arith.constant 0 : index
    %c0_17 = arith.constant 0 : index
    %13 = vector.load %arg7[%c0_15, %c0_16, %c0_17] : memref<4x1x8xf32, #tpu.memory_space<vmem>>, vector<1x1x8xf32>
    %14 = vector.shape_cast %13 : vector<1x1x8xf32> to vector<1x8xf32>
    %15 = vector.broadcast %14 : vector<1x8xf32> to vector<8x8xf32>
    %16 = arith.addf %12, %15 : vector<8x8xf32>
    %c0_18 = arith.constant 0 : index
    %c0_19 = arith.constant 0 : index
    %c0_20 = arith.constant 0 : index
    %17 = vector.load %arg8[%c0_18, %c0_19, %c0_20] : memref<4x32x8xf32, #tpu.memory_space<vmem>>, vector<1x32x8xf32>
    %18 = vector.shape_cast %17 : vector<1x32x8xf32> to vector<32x8xf32>
    %cst_21 = arith.constant dense<0.000000e+00> : vector<8x8xf32>
    %19 = tpu.matmul %2, %18, %cst_21 {dimension_numbers = #tpu.dot_dimension_numbers<[1], [0], [0], [1], [0, 0, 1, 1], [], []>} : vector<8x32xf32>, vector<32x8xf32>, vector<8x8xf32> -> vector<8x8xf32>
    %c0_22 = arith.constant 0 : index
    %c0_23 = arith.constant 0 : index
    %c0_24 = arith.constant 0 : index
    %20 = vector.load %arg9[%c0_22, %c0_23, %c0_24] : memref<4x1x8xf32, #tpu.memory_space<vmem>>, vector<1x1x8xf32>
    %21 = vector.shape_cast %20 : vector<1x1x8xf32> to vector<1x8xf32>
    %22 = vector.broadcast %21 : vector<1x8xf32> to vector<8x8xf32>
    %23 = arith.addf %19, %22 : vector<8x8xf32>
    %c1 = arith.constant 1 : index
    %c0_25 = arith.constant 0 : index
    %c0_26 = arith.constant 0 : index
    %24 = vector.load %arg4[%c1, %c0_25, %c0_26] : memref<4x32x8xf32, #tpu.memory_space<vmem>>, vector<1x32x8xf32>
    %25 = vector.shape_cast %24 : vector<1x32x8xf32> to vector<32x8xf32>
    %cst_27 = arith.constant dense<0.000000e+00> : vector<8x8xf32>
    %26 = tpu.matmul %0, %25, %cst_27 {dimension_numbers = #tpu.dot_dimension_numbers<[1], [0], [0], [1], [0, 0, 1, 1], [], []>} : vector<8x32xf32>, vector<32x8xf32>, vector<8x8xf32> -> vector<8x8xf32>
    %c1_28 = arith.constant 1 : index
    %c0_29 = arith.constant 0 : index
    %c0_30 = arith.constant 0 : index
    %27 = vector.load %arg5[%c1_28, %c0_29, %c0_30] : memref<4x1x8xf32, #tpu.memory_space<vmem>>, vector<1x1x8xf32>
    %28 = vector.shape_cast %27 : vector<1x1x8xf32> to vector<1x8xf32>
    %29 = vector.broadcast %28 : vector<1x8xf32> to vector<8x8xf32>
    %30 = arith.addf %26, %29 : vector<8x8xf32>
    %c1_31 = arith.constant 1 : index
    %c0_32 = arith.constant 0 : index
    %c0_33 = arith.constant 0 : index
    %31 = vector.load %arg6[%c1_31, %c0_32, %c0_33] : memref<4x32x8xf32, #tpu.memory_space<vmem>>, vector<1x32x8xf32>
    %32 = vector.shape_cast %31 : vector<1x32x8xf32> to vector<32x8xf32>
    %cst_34 = arith.constant dense<0.000000e+00> : vector<8x8xf32>
    %33 = tpu.matmul %1, %32, %cst_34 {dimension_numbers = #tpu.dot_dimension_numbers<[1], [0], [0], [1], [0, 0, 1, 1], [], []>} : vector<8x32xf32>, vector<32x8xf32>, vector<8x8xf32> -> vector<8x8xf32>
    %c1_35 = arith.constant 1 : index
    %c0_36 = arith.constant 0 : index
    %c0_37 = arith.constant 0 : index
    %34 = vector.load %arg7[%c1_35, %c0_36, %c0_37] : memref<4x1x8xf32, #tpu.memory_space<vmem>>, vector<1x1x8xf32>
    %35 = vector.shape_cast %34 : vector<1x1x8xf32> to vector<1x8xf32>
    %36 = vector.broadcast %35 : vector<1x8xf32> to vector<8x8xf32>
    %37 = arith.addf %33, %36 : vector<8x8xf32>
    %c1_38 = arith.constant 1 : index
    %c0_39 = arith.constant 0 : index
    %c0_40 = arith.constant 0 : index
    %38 = vector.load %arg8[%c1_38, %c0_39, %c0_40] : memref<4x32x8xf32, #tpu.memory_space<vmem>>, vector<1x32x8xf32>
    %39 = vector.shape_cast %38 : vector<1x32x8xf32> to vector<32x8xf32>
    %cst_41 = arith.constant dense<0.000000e+00> : vector<8x8xf32>
    %40 = tpu.matmul %2, %39, %cst_41 {dimension_numbers = #tpu.dot_dimension_numbers<[1], [0], [0], [1], [0, 0, 1, 1], [], []>} : vector<8x32xf32>, vector<32x8xf32>, vector<8x8xf32> -> vector<8x8xf32>
    %c1_42 = arith.constant 1 : index
    %c0_43 = arith.constant 0 : index
    %c0_44 = arith.constant 0 : index
    %41 = vector.load %arg9[%c1_42, %c0_43, %c0_44] : memref<4x1x8xf32, #tpu.memory_space<vmem>>, vector<1x1x8xf32>
    %42 = vector.shape_cast %41 : vector<1x1x8xf32> to vector<1x8xf32>
    %43 = vector.broadcast %42 : vector<1x8xf32> to vector<8x8xf32>
    %44 = arith.addf %40, %43 : vector<8x8xf32>
    %c2 = arith.constant 2 : index
    %c0_45 = arith.constant 0 : index
    %c0_46 = arith.constant 0 : index
    %45 = vector.load %arg4[%c2, %c0_45, %c0_46] : memref<4x32x8xf32, #tpu.memory_space<vmem>>, vector<1x32x8xf32>
    %46 = vector.shape_cast %45 : vector<1x32x8xf32> to vector<32x8xf32>
    %cst_47 = arith.constant dense<0.000000e+00> : vector<8x8xf32>
    %47 = tpu.matmul %0, %46, %cst_47 {dimension_numbers = #tpu.dot_dimension_numbers<[1], [0], [0], [1], [0, 0, 1, 1], [], []>} : vector<8x32xf32>, vector<32x8xf32>, vector<8x8xf32> -> vector<8x8xf32>
    %c2_48 = arith.constant 2 : index
    %c0_49 = arith.constant 0 : index
    %c0_50 = arith.constant 0 : index
    %48 = vector.load %arg5[%c2_48, %c0_49, %c0_50] : memref<4x1x8xf32, #tpu.memory_space<vmem>>, vector<1x1x8xf32>
    %49 = vector.shape_cast %48 : vector<1x1x8xf32> to vector<1x8xf32>
    %50 = vector.broadcast %49 : vector<1x8xf32> to vector<8x8xf32>
    %51 = arith.addf %47, %50 : vector<8x8xf32>
    %c2_51 = arith.constant 2 : index
    %c0_52 = arith.constant 0 : index
    %c0_53 = arith.constant 0 : index
    %52 = vector.load %arg6[%c2_51, %c0_52, %c0_53] : memref<4x32x8xf32, #tpu.memory_space<vmem>>, vector<1x32x8xf32>
    %53 = vector.shape_cast %52 : vector<1x32x8xf32> to vector<32x8xf32>
    %cst_54 = arith.constant dense<0.000000e+00> : vector<8x8xf32>
    %54 = tpu.matmul %1, %53, %cst_54 {dimension_numbers = #tpu.dot_dimension_numbers<[1], [0], [0], [1], [0, 0, 1, 1], [], []>} : vector<8x32xf32>, vector<32x8xf32>, vector<8x8xf32> -> vector<8x8xf32>
    %c2_55 = arith.constant 2 : index
    %c0_56 = arith.constant 0 : index
    %c0_57 = arith.constant 0 : index
    %55 = vector.load %arg7[%c2_55, %c0_56, %c0_57] : memref<4x1x8xf32, #tpu.memory_space<vmem>>, vector<1x1x8xf32>
    %56 = vector.shape_cast %55 : vector<1x1x8xf32> to vector<1x8xf32>
    %57 = vector.broadcast %56 : vector<1x8xf32> to vector<8x8xf32>
    %58 = arith.addf %54, %57 : vector<8x8xf32>
    %c2_58 = arith.constant 2 : index
    %c0_59 = arith.constant 0 : index
    %c0_60 = arith.constant 0 : index
    %59 = vector.load %arg8[%c2_58, %c0_59, %c0_60] : memref<4x32x8xf32, #tpu.memory_space<vmem>>, vector<1x32x8xf32>
    %60 = vector.shape_cast %59 : vector<1x32x8xf32> to vector<32x8xf32>
    %cst_61 = arith.constant dense<0.000000e+00> : vector<8x8xf32>
    %61 = tpu.matmul %2, %60, %cst_61 {dimension_numbers = #tpu.dot_dimension_numbers<[1], [0], [0], [1], [0, 0, 1, 1], [], []>} : vector<8x32xf32>, vector<32x8xf32>, vector<8x8xf32> -> vector<8x8xf32>
    %c2_62 = arith.constant 2 : index
    %c0_63 = arith.constant 0 : index
    %c0_64 = arith.constant 0 : index
    %62 = vector.load %arg9[%c2_62, %c0_63, %c0_64] : memref<4x1x8xf32, #tpu.memory_space<vmem>>, vector<1x1x8xf32>
    %63 = vector.shape_cast %62 : vector<1x1x8xf32> to vector<1x8xf32>
    %64 = vector.broadcast %63 : vector<1x8xf32> to vector<8x8xf32>
    %65 = arith.addf %61, %64 : vector<8x8xf32>
    %c3 = arith.constant 3 : index
    %c0_65 = arith.constant 0 : index
    %c0_66 = arith.constant 0 : index
    %66 = vector.load %arg4[%c3, %c0_65, %c0_66] : memref<4x32x8xf32, #tpu.memory_space<vmem>>, vector<1x32x8xf32>
    %67 = vector.shape_cast %66 : vector<1x32x8xf32> to vector<32x8xf32>
    %cst_67 = arith.constant dense<0.000000e+00> : vector<8x8xf32>
    %68 = tpu.matmul %0, %67, %cst_67 {dimension_numbers = #tpu.dot_dimension_numbers<[1], [0], [0], [1], [0, 0, 1, 1], [], []>} : vector<8x32xf32>, vector<32x8xf32>, vector<8x8xf32> -> vector<8x8xf32>
    %c3_68 = arith.constant 3 : index
    %c0_69 = arith.constant 0 : index
    %c0_70 = arith.constant 0 : index
    %69 = vector.load %arg5[%c3_68, %c0_69, %c0_70] : memref<4x1x8xf32, #tpu.memory_space<vmem>>, vector<1x1x8xf32>
    %70 = vector.shape_cast %69 : vector<1x1x8xf32> to vector<1x8xf32>
    %71 = vector.broadcast %70 : vector<1x8xf32> to vector<8x8xf32>
    %72 = arith.addf %68, %71 : vector<8x8xf32>
    %c3_71 = arith.constant 3 : index
    %c0_72 = arith.constant 0 : index
    %c0_73 = arith.constant 0 : index
    %73 = vector.load %arg6[%c3_71, %c0_72, %c0_73] : memref<4x32x8xf32, #tpu.memory_space<vmem>>, vector<1x32x8xf32>
    %74 = vector.shape_cast %73 : vector<1x32x8xf32> to vector<32x8xf32>
    %cst_74 = arith.constant dense<0.000000e+00> : vector<8x8xf32>
    %75 = tpu.matmul %1, %74, %cst_74 {dimension_numbers = #tpu.dot_dimension_numbers<[1], [0], [0], [1], [0, 0, 1, 1], [], []>} : vector<8x32xf32>, vector<32x8xf32>, vector<8x8xf32> -> vector<8x8xf32>
    %c3_75 = arith.constant 3 : index
    %c0_76 = arith.constant 0 : index
    %c0_77 = arith.constant 0 : index
    %76 = vector.load %arg7[%c3_75, %c0_76, %c0_77] : memref<4x1x8xf32, #tpu.memory_space<vmem>>, vector<1x1x8xf32>
    %77 = vector.shape_cast %76 : vector<1x1x8xf32> to vector<1x8xf32>
    %78 = vector.broadcast %77 : vector<1x8xf32> to vector<8x8xf32>
    %79 = arith.addf %75, %78 : vector<8x8xf32>
    %c3_78 = arith.constant 3 : index
    %c0_79 = arith.constant 0 : index
    %c0_80 = arith.constant 0 : index
    %80 = vector.load %arg8[%c3_78, %c0_79, %c0_80] : memref<4x32x8xf32, #tpu.memory_space<vmem>>, vector<1x32x8xf32>
    %81 = vector.shape_cast %80 : vector<1x32x8xf32> to vector<32x8xf32>
    %cst_81 = arith.constant dense<0.000000e+00> : vector<8x8xf32>
    %82 = tpu.matmul %2, %81, %cst_81 {dimension_numbers = #tpu.dot_dimension_numbers<[1], [0], [0], [1], [0, 0, 1, 1], [], []>} : vector<8x32xf32>, vector<32x8xf32>, vector<8x8xf32> -> vector<8x8xf32>
    %c3_82 = arith.constant 3 : index
    %c0_83 = arith.constant 0 : index
    %c0_84 = arith.constant 0 : index
    %83 = vector.load %arg9[%c3_82, %c0_83, %c0_84] : memref<4x1x8xf32, #tpu.memory_space<vmem>>, vector<1x1x8xf32>
    %84 = vector.shape_cast %83 : vector<1x1x8xf32> to vector<1x8xf32>
    %85 = vector.broadcast %84 : vector<1x8xf32> to vector<8x8xf32>
    %86 = arith.addf %82, %85 : vector<8x8xf32>
    %87 = tpu.concatenate %9, %30, %51, %72 in 0 : vector<8x8xf32>, vector<8x8xf32>, vector<8x8xf32>, vector<8x8xf32> -> vector<32x8xf32>
    %cst_85 = arith.constant 0.353553385 : f32
    %88 = vector.broadcast %cst_85 : f32 to vector<32x8xf32>
    %89 = arith.mulf %87, %88 : vector<32x8xf32>
    %90 = tpu.concatenate %16, %37, %58, %79 in 0 : vector<8x8xf32>, vector<8x8xf32>, vector<8x8xf32>, vector<8x8xf32> -> vector<32x8xf32>
    %91 = tpu.concatenate %23, %44, %65, %86 in 0 : vector<8x8xf32>, vector<8x8xf32>, vector<8x8xf32>, vector<8x8xf32> -> vector<32x8xf32>
    %cst_86 = arith.constant dense<0.000000e+00> : vector<32x32xf32>
    %92 = tpu.matmul %89, %90, %cst_86 {dimension_numbers = #tpu.dot_dimension_numbers<[1], [1], [0], [0], [0, 0, 1, 0], [], []>} : vector<32x8xf32>, vector<32x8xf32>, vector<32x32xf32> -> vector<32x32xf32>
    %c0_87 = arith.constant 0 : index
    %c0_88 = arith.constant 0 : index
    %93 = vector.load %arg10[%c0_87, %c0_88] : memref<8x8xf32, #tpu.memory_space<vmem>>, vector<8x8xf32>
    %cst_89 = arith.constant dense<0.000000e+00> : vector<32x8xf32>
    %94 = tpu.matmul %89, %93, %cst_89 {dimension_numbers = #tpu.dot_dimension_numbers<[1], [0], [0], [1], [0, 0, 1, 1], [], []>} : vector<32x8xf32>, vector<8x8xf32>, vector<32x8xf32> -> vector<32x8xf32>
    %95 = tpu.iota {dimensions = array<i32: 0>} : vector<32x32xi32>
    %96 = tpu.iota {dimensions = array<i32: 1>} : vector<32x32xi32>
    %c3_i32 = arith.constant 3 : i32
    %97 = vector.broadcast %c3_i32 : i32 to vector<32x32xi32>
    %98 = arith.shrsi %95, %97 : vector<32x32xi32>
    %c3_i32_90 = arith.constant 3 : i32
    %99 = vector.broadcast %c3_i32_90 : i32 to vector<32x32xi32>
    %100 = arith.shrsi %96, %99 : vector<32x32xi32>
    %101 = arith.cmpi eq, %98, %100 : vector<32x32xi32>
    %c7_i32 = arith.constant 7 : i32
    %102 = vector.broadcast %c7_i32 : i32 to vector<32x32xi32>
    %103 = arith.andi %95, %102 : vector<32x32xi32>
    %c7_i32_91 = arith.constant 7 : i32
    %104 = vector.broadcast %c7_i32_91 : i32 to vector<32x32xi32>
    %105 = arith.andi %96, %104 : vector<32x32xi32>
    %106 = arith.subi %103, %105 : vector<32x32xi32>
    %c7_i32_92 = arith.constant 7 : i32
    %107 = vector.broadcast %c7_i32_92 : i32 to vector<32x32xi32>
    %108 = arith.subi %107, %106 : vector<32x32xi32>
    %c-1_i32 = arith.constant -1 : i32
    %109 = vector.broadcast %c-1_i32 : i32 to vector<32x32xi32>
    %110 = arith.select %101, %108, %109 : vector<32x32xi1>, vector<32x32xi32>
    %cst_93 = arith.constant -1.000000e+30 : f32
    %111 = vector.broadcast %cst_93 : f32 to vector<32x32xf32>
    %112 = arith.select %101, %92, %111 : vector<32x32xi1>, vector<32x32xf32>
    %c0_i32 = arith.constant 0 : i32
    %113 = vector.broadcast %c0_i32 : i32 to vector<32x32xi32>
    %114 = arith.cmpi eq, %110, %113 : vector<32x32xi32>
    %115 = vector.extract_strided_slice %94 {offsets = [0, 0], sizes = [32, 1], strides = [1, 1]} : vector<32x8xf32> to vector<32x1xf32>
    %cst_94 = arith.constant 0.000000e+00 : f32
    %116 = vector.shape_cast %115 : vector<32x1xf32> to vector<32x1xf32>
    %117 = vector.broadcast %116 : vector<32x1xf32> to vector<32x32xf32>
    %118 = vector.broadcast %cst_94 : f32 to vector<32x32xf32>
    %119 = arith.select %114, %117, %118 : vector<32x32xi1>, vector<32x32xf32>
    %120 = arith.addf %112, %119 : vector<32x32xf32>
    %c1_i32 = arith.constant 1 : i32
    %121 = vector.broadcast %c1_i32 : i32 to vector<32x32xi32>
    %122 = arith.cmpi eq, %110, %121 : vector<32x32xi32>
    %123 = vector.extract_strided_slice %94 {offsets = [0, 1], sizes = [32, 1], strides = [1, 1]} : vector<32x8xf32> to vector<32x1xf32>
    %cst_95 = arith.constant 0.000000e+00 : f32
    %124 = vector.shape_cast %123 : vector<32x1xf32> to vector<32x1xf32>
    %125 = vector.broadcast %124 : vector<32x1xf32> to vector<32x32xf32>
    %126 = vector.broadcast %cst_95 : f32 to vector<32x32xf32>
    %127 = arith.select %122, %125, %126 : vector<32x32xi1>, vector<32x32xf32>
    %128 = arith.addf %120, %127 : vector<32x32xf32>
    %c2_i32 = arith.constant 2 : i32
    %129 = vector.broadcast %c2_i32 : i32 to vector<32x32xi32>
    %130 = arith.cmpi eq, %110, %129 : vector<32x32xi32>
    %131 = vector.extract_strided_slice %94 {offsets = [0, 2], sizes = [32, 1], strides = [1, 1]} : vector<32x8xf32> to vector<32x1xf32>
    %cst_96 = arith.constant 0.000000e+00 : f32
    %132 = vector.shape_cast %131 : vector<32x1xf32> to vector<32x1xf32>
    %133 = vector.broadcast %132 : vector<32x1xf32> to vector<32x32xf32>
    %134 = vector.broadcast %cst_96 : f32 to vector<32x32xf32>
    %135 = arith.select %130, %133, %134 : vector<32x32xi1>, vector<32x32xf32>
    %136 = arith.addf %128, %135 : vector<32x32xf32>
    %c3_i32_97 = arith.constant 3 : i32
    %137 = vector.broadcast %c3_i32_97 : i32 to vector<32x32xi32>
    %138 = arith.cmpi eq, %110, %137 : vector<32x32xi32>
    %139 = vector.extract_strided_slice %94 {offsets = [0, 3], sizes = [32, 1], strides = [1, 1]} : vector<32x8xf32> to vector<32x1xf32>
    %cst_98 = arith.constant 0.000000e+00 : f32
    %140 = vector.shape_cast %139 : vector<32x1xf32> to vector<32x1xf32>
    %141 = vector.broadcast %140 : vector<32x1xf32> to vector<32x32xf32>
    %142 = vector.broadcast %cst_98 : f32 to vector<32x32xf32>
    %143 = arith.select %138, %141, %142 : vector<32x32xi1>, vector<32x32xf32>
    %144 = arith.addf %136, %143 : vector<32x32xf32>
    %c4_i32 = arith.constant 4 : i32
    %145 = vector.broadcast %c4_i32 : i32 to vector<32x32xi32>
    %146 = arith.cmpi eq, %110, %145 : vector<32x32xi32>
    %147 = vector.extract_strided_slice %94 {offsets = [0, 4], sizes = [32, 1], strides = [1, 1]} : vector<32x8xf32> to vector<32x1xf32>
    %cst_99 = arith.constant 0.000000e+00 : f32
    %148 = vector.shape_cast %147 : vector<32x1xf32> to vector<32x1xf32>
    %149 = vector.broadcast %148 : vector<32x1xf32> to vector<32x32xf32>
    %150 = vector.broadcast %cst_99 : f32 to vector<32x32xf32>
    %151 = arith.select %146, %149, %150 : vector<32x32xi1>, vector<32x32xf32>
    %152 = arith.addf %144, %151 : vector<32x32xf32>
    %c5_i32 = arith.constant 5 : i32
    %153 = vector.broadcast %c5_i32 : i32 to vector<32x32xi32>
    %154 = arith.cmpi eq, %110, %153 : vector<32x32xi32>
    %155 = vector.extract_strided_slice %94 {offsets = [0, 5], sizes = [32, 1], strides = [1, 1]} : vector<32x8xf32> to vector<32x1xf32>
    %cst_100 = arith.constant 0.000000e+00 : f32
    %156 = vector.shape_cast %155 : vector<32x1xf32> to vector<32x1xf32>
    %157 = vector.broadcast %156 : vector<32x1xf32> to vector<32x32xf32>
    %158 = vector.broadcast %cst_100 : f32 to vector<32x32xf32>
    %159 = arith.select %154, %157, %158 : vector<32x32xi1>, vector<32x32xf32>
    %160 = arith.addf %152, %159 : vector<32x32xf32>
    %c6_i32 = arith.constant 6 : i32
    %161 = vector.broadcast %c6_i32 : i32 to vector<32x32xi32>
    %162 = arith.cmpi eq, %110, %161 : vector<32x32xi32>
    %163 = vector.extract_strided_slice %94 {offsets = [0, 6], sizes = [32, 1], strides = [1, 1]} : vector<32x8xf32> to vector<32x1xf32>
    %cst_101 = arith.constant 0.000000e+00 : f32
    %164 = vector.shape_cast %163 : vector<32x1xf32> to vector<32x1xf32>
    %165 = vector.broadcast %164 : vector<32x1xf32> to vector<32x32xf32>
    %166 = vector.broadcast %cst_101 : f32 to vector<32x32xf32>
    %167 = arith.select %162, %165, %166 : vector<32x32xi1>, vector<32x32xf32>
    %168 = arith.addf %160, %167 : vector<32x32xf32>
    %c7_i32_102 = arith.constant 7 : i32
    %169 = vector.broadcast %c7_i32_102 : i32 to vector<32x32xi32>
    %170 = arith.cmpi eq, %110, %169 : vector<32x32xi32>
    %171 = vector.extract_strided_slice %94 {offsets = [0, 7], sizes = [32, 1], strides = [1, 1]} : vector<32x8xf32> to vector<32x1xf32>
    %cst_103 = arith.constant 0.000000e+00 : f32
    %172 = vector.shape_cast %171 : vector<32x1xf32> to vector<32x1xf32>
    %173 = vector.broadcast %172 : vector<32x1xf32> to vector<32x32xf32>
    %174 = vector.broadcast %cst_103 : f32 to vector<32x32xf32>
    %175 = arith.select %170, %173, %174 : vector<32x32xi1>, vector<32x32xf32>
    %176 = arith.addf %168, %175 : vector<32x32xf32>
    %cst_104 = arith.constant dense<0xFF800000> : vector<32xf32>
    %177 = vector.multi_reduction <maximumf>, %176, %cst_104 [1] : vector<32x32xf32> to vector<32xf32>
    %178 = vector.shape_cast %177 : vector<32xf32> to vector<32x1xf32>
    %179 = vector.broadcast %178 : vector<32x1xf32> to vector<32x32xf32>
    %180 = arith.subf %176, %179 : vector<32x32xf32>
    %181 = math.exp %180 : vector<32x32xf32>
    %cst_105 = arith.constant dense<0.000000e+00> : vector<32xf32>
    %182 = vector.multi_reduction <add>, %181, %cst_105 [1] : vector<32x32xf32> to vector<32xf32>
    %183 = vector.shape_cast %182 : vector<32xf32> to vector<32x1xf32>
    %cst_106 = arith.constant dense<0.000000e+00> : vector<32x8xf32>
    %184 = tpu.matmul %181, %91, %cst_106 {dimension_numbers = #tpu.dot_dimension_numbers<[1], [0], [0], [1], [0, 0, 1, 1], [], []>} : vector<32x32xf32>, vector<32x8xf32>, vector<32x8xf32> -> vector<32x8xf32>
    %185 = tpu.reciprocal %183 : vector<32x1xf32> -> vector<32x1xf32>
    %186 = vector.broadcast %185 : vector<32x1xf32> to vector<32x8xf32>
    %187 = arith.mulf %184, %186 : vector<32x8xf32>
    %188 = vector.extract_strided_slice %187 {offsets = [0, 0], sizes = [8, 8], strides = [1, 1]} : vector<32x8xf32> to vector<8x8xf32>
    %c0_107 = arith.constant 0 : index
    %c0_108 = arith.constant 0 : index
    %c0_109 = arith.constant 0 : index
    %189 = vector.load %arg11[%c0_107, %c0_108, %c0_109] : memref<4x8x32xf32, #tpu.memory_space<vmem>>, vector<1x8x32xf32>
    %190 = vector.shape_cast %189 : vector<1x8x32xf32> to vector<8x32xf32>
    %cst_110 = arith.constant dense<0.000000e+00> : vector<8x32xf32>
    %191 = tpu.matmul %188, %190, %cst_110 {dimension_numbers = #tpu.dot_dimension_numbers<[1], [0], [0], [1], [0, 0, 1, 1], [], []>} : vector<8x8xf32>, vector<8x32xf32>, vector<8x32xf32> -> vector<8x32xf32>
    %192 = vector.extract_strided_slice %187 {offsets = [8, 0], sizes = [8, 8], strides = [1, 1]} : vector<32x8xf32> to vector<8x8xf32>
    %c1_111 = arith.constant 1 : index
    %c0_112 = arith.constant 0 : index
    %c0_113 = arith.constant 0 : index
    %193 = vector.load %arg11[%c1_111, %c0_112, %c0_113] : memref<4x8x32xf32, #tpu.memory_space<vmem>>, vector<1x8x32xf32>
    %194 = vector.shape_cast %193 : vector<1x8x32xf32> to vector<8x32xf32>
    %cst_114 = arith.constant dense<0.000000e+00> : vector<8x32xf32>
    %195 = tpu.matmul %192, %194, %cst_114 {dimension_numbers = #tpu.dot_dimension_numbers<[1], [0], [0], [1], [0, 0, 1, 1], [], []>} : vector<8x8xf32>, vector<8x32xf32>, vector<8x32xf32> -> vector<8x32xf32>
    %196 = arith.addf %191, %195 : vector<8x32xf32>
    %197 = vector.extract_strided_slice %187 {offsets = [16, 0], sizes = [8, 8], strides = [1, 1]} : vector<32x8xf32> to vector<8x8xf32>
    %c2_115 = arith.constant 2 : index
    %c0_116 = arith.constant 0 : index
    %c0_117 = arith.constant 0 : index
    %198 = vector.load %arg11[%c2_115, %c0_116, %c0_117] : memref<4x8x32xf32, #tpu.memory_space<vmem>>, vector<1x8x32xf32>
    %199 = vector.shape_cast %198 : vector<1x8x32xf32> to vector<8x32xf32>
    %cst_118 = arith.constant dense<0.000000e+00> : vector<8x32xf32>
    %200 = tpu.matmul %197, %199, %cst_118 {dimension_numbers = #tpu.dot_dimension_numbers<[1], [0], [0], [1], [0, 0, 1, 1], [], []>} : vector<8x8xf32>, vector<8x32xf32>, vector<8x32xf32> -> vector<8x32xf32>
    %201 = arith.addf %196, %200 : vector<8x32xf32>
    %202 = vector.extract_strided_slice %187 {offsets = [24, 0], sizes = [8, 8], strides = [1, 1]} : vector<32x8xf32> to vector<8x8xf32>
    %c3_119 = arith.constant 3 : index
    %c0_120 = arith.constant 0 : index
    %c0_121 = arith.constant 0 : index
    %203 = vector.load %arg11[%c3_119, %c0_120, %c0_121] : memref<4x8x32xf32, #tpu.memory_space<vmem>>, vector<1x8x32xf32>
    %204 = vector.shape_cast %203 : vector<1x8x32xf32> to vector<8x32xf32>
    %cst_122 = arith.constant dense<0.000000e+00> : vector<8x32xf32>
    %205 = tpu.matmul %202, %204, %cst_122 {dimension_numbers = #tpu.dot_dimension_numbers<[1], [0], [0], [1], [0, 0, 1, 1], [], []>} : vector<8x8xf32>, vector<8x32xf32>, vector<8x32xf32> -> vector<8x32xf32>
    %206 = arith.addf %201, %205 : vector<8x32xf32>
    %c0_123 = arith.constant 0 : index
    %c0_124 = arith.constant 0 : index
    %207 = vector.load %arg12[%c0_123, %c0_124] : memref<1x32xf32, #tpu.memory_space<vmem>>, vector<1x32xf32>
    %208 = vector.broadcast %207 : vector<1x32xf32> to vector<8x32xf32>
    %209 = arith.addf %206, %208 : vector<8x32xf32>
    %c0_125 = arith.constant 0 : index
    %c0_126 = arith.constant 0 : index
    %210 = vector.load %arg13[%c0_125, %c0_126] : memref<8x32xf32, #tpu.memory_space<vmem>>, vector<8x32xf32>
    tpu.vector_store %arg13[%c0_125, %c0_126], %209 {strides = array<i32>} : memref<8x32xf32, #tpu.memory_space<vmem>>, vector<8x32xf32>,
    return
  }
  func.func @transform_0(%arg0: i32) -> (i32, i32) {
    %c0_i32 = arith.constant 0 : i32
    %c0_i32_0 = arith.constant 0 : i32
    return %arg0, %c0_i32 : i32, i32
  }
  func.func @transform_1(%arg0: i32) -> (i32, i32) {
    %c0_i32 = arith.constant 0 : i32
    %c0_i32_0 = arith.constant 0 : i32
    return %arg0, %c0_i32 : i32, i32
  }
  func.func @transform_2(%arg0: i32) -> (i32, i32) {
    %c0_i32 = arith.constant 0 : i32
    %c0_i32_0 = arith.constant 0 : i32
    return %arg0, %c0_i32 : i32, i32
  }
  func.func @transform_3(%arg0: i32) -> (i32, i32, i32) {
    %c0_i32 = arith.constant 0 : i32
    %c0_i32_0 = arith.constant 0 : i32
    %c0_i32_1 = arith.constant 0 : i32
    %c0_i32_2 = arith.constant 0 : i32
    return %c0_i32, %c0_i32_0, %c0_i32_1 : i32, i32, i32
  }
  func.func @transform_4(%arg0: i32) -> (i32, i32, i32) {
    %c0_i32 = arith.constant 0 : i32
    %c0_i32_0 = arith.constant 0 : i32
    %c0_i32_1 = arith.constant 0 : i32
    %c0_i32_2 = arith.constant 0 : i32
    return %c0_i32, %c0_i32_0, %c0_i32_1 : i32, i32, i32
  }
  func.func @transform_5(%arg0: i32) -> (i32, i32, i32) {
    %c0_i32 = arith.constant 0 : i32
    %c0_i32_0 = arith.constant 0 : i32
    %c0_i32_1 = arith.constant 0 : i32
    %c0_i32_2 = arith.constant 0 : i32
    return %c0_i32, %c0_i32_0, %c0_i32_1 : i32, i32, i32
  }
  func.func @transform_6(%arg0: i32) -> (i32, i32, i32) {
    %c0_i32 = arith.constant 0 : i32
    %c0_i32_0 = arith.constant 0 : i32
    %c0_i32_1 = arith.constant 0 : i32
    %c0_i32_2 = arith.constant 0 : i32
    return %c0_i32, %c0_i32_0, %c0_i32_1 : i32, i32, i32
  }
  func.func @transform_7(%arg0: i32) -> (i32, i32, i32) {
    %c0_i32 = arith.constant 0 : i32
    %c0_i32_0 = arith.constant 0 : i32
    %c0_i32_1 = arith.constant 0 : i32
    %c0_i32_2 = arith.constant 0 : i32
    return %c0_i32, %c0_i32_0, %c0_i32_1 : i32, i32, i32
  }
  func.func @transform_8(%arg0: i32) -> (i32, i32, i32) {
    %c0_i32 = arith.constant 0 : i32
    %c0_i32_0 = arith.constant 0 : i32
    %c0_i32_1 = arith.constant 0 : i32
    %c0_i32_2 = arith.constant 0 : i32
    return %c0_i32, %c0_i32_0, %c0_i32_1 : i32, i32, i32
  }
  func.func @transform_9(%arg0: i32) -> (i32, i32) {
    %c0_i32 = arith.constant 0 : i32
    %c0_i32_0 = arith.constant 0 : i32
    %c0_i32_1 = arith.constant 0 : i32
    return %c0_i32, %c0_i32_0 : i32, i32
  }
  func.func @transform_10(%arg0: i32) -> (i32, i32, i32) {
    %c0_i32 = arith.constant 0 : i32
    %c0_i32_0 = arith.constant 0 : i32
    %c0_i32_1 = arith.constant 0 : i32
    %c0_i32_2 = arith.constant 0 : i32
    return %c0_i32, %c0_i32_0, %c0_i32_1 : i32, i32, i32
  }
  func.func @transform_11(%arg0: i32) -> (i32, i32) {
    %c0_i32 = arith.constant 0 : i32
    %c0_i32_0 = arith.constant 0 : i32
    %c0_i32_1 = arith.constant 0 : i32
    return %c0_i32, %c0_i32_0 : i32, i32
  }
  func.func @transform_12(%arg0: i32) -> (i32, i32) {
    %c0_i32 = arith.constant 0 : i32
    %c0_i32_0 = arith.constant 0 : i32
    return %arg0, %c0_i32 : i32, i32
  }
}

</mosaic_0001>

<bundles_post_ra>
// kernel: tpu_custom_call.1
= control target key start
LH: loop header
LB: loop body
LE: loop exit
PB: predicated region body
PF: predicated region fallthrough
CT: control target
= control target key end

     0   :  { %s3601_s0 = inlined_call_operand.vmem [shape: f32[16,32], index: 0, kind: input, shape index: {}]   ;;  %s3602_s1 = inlined_call_operand.vmem [shape: f32[16,32], index: 1, kind: input, shape index: {}]   ;;  %s3603_s2 = inlined_call_operand.vmem [shape: f32[16,32], index: 2, kind: input, shape index: {}]   ;;  %s3604_s3 = inlined_call_operand.vmem [shape: f32[4,32,8], index: 3, kind: input, shape index: {}]   ;;  %s3605_s4 = inlined_call_operand.vmem [shape: f32[4,1,8], index: 4, kind: input, shape index: {}]   ;;  %s3606_s5 = inlined_call_operand.vmem [shape: f32[4,32,8], index: 5, kind: input, shape index: {}]   ;;  %s3607_s6 = inlined_call_operand.vmem [shape: f32[4,1,8], index: 6, kind: input, shape index: {}]   ;;  %s3608_s7 = inlined_call_operand.vmem [shape: f32[4,32,8], index: 7, kind: input, shape index: {}]   ;;  %s3609_s8 = inlined_call_operand.vmem [shape: f32[4,1,8], index: 8, kind: input, shape index: {}]   ;;  %s3610_s9 = inlined_call_operand.vmem [shape: f32[8,8], index: 9, kind: input, shape index: {}]   ;;  %s3611_s10 = inlined_call_operand.vmem [shape: f32[4,8,32], index: 10, kind: input, shape index: {}]   ;;  %s3612_s11 = inlined_call_operand.vmem [shape: f32[1,32], index: 11, kind: input, shape index: {}]   ;;  %s3613_s12 = inlined_call_operand.hbm [shape: f32[16,32], index: 12, kind: output, shape index: {}]  }
   0x1   :  { %3615 = sst [smem:[#allocation7_spill]] %s3601_s0 }
   0x2   :  { %17 = vsyncpa [#allocation3], 0 }
   0x3   :  { %19 = vsyncpa [#allocation3 + $0x1], 0  ;;  %s3076_s21 = smov 0   ;;  %s3078_s22 = smov 0  }
   0x4   :  { %s3080_s23 = smov 0   ;;  %s3082_s24 = smov 0  }
   0x5 LB: > { %3616 = sst [smem:[#allocation5_spill]] %s2994_s23  ;;  %s3097_s25 = sadd.s32 4294967295, %s2998_s24   ;;  %s2998_s24 = sphi %s3082_s24, %s3631_s24   ;;  %s2994_s23 = sphi %s3080_s23, %s3628_s23   ;;  %s2990_s22 = sphi %s3078_s22, %s3630_s22   ;;  %s2986_s21 = sphi %s3076_s21, %s3629_s21  }
   0x6   : > { %s2459_s26 = sadd.s32 4294967294, %s2998_s24   ;;  %s3101_s27 = sadd.s32 1, %s2998_s24  }
   0x7   : > { %s299_s28 = sadd.s32 1, %s2994_s23  ;;  %s296_s29 = ssub.s32 %s2998_s24, %s3101_s27 }
   0x8   : > { %p309_p0 = scmp.ne.s32.totalorder %s2994_s23, %s2990_s22  ;;  %p297_p1 = scmp.eq.s32.totalorder %s296_s29, 0 }
   0x9   : > { %p310_p2 = scmp.eq.s32.totalorder %s3097_s25, 1  ;;  %p315_p3 = scmp.ne.s32.totalorder %s2990_s22, %s2986_s21 }
   0xa   : > { %p316_p4 = scmp.eq.s32.totalorder %s2459_s26, 1  ;;  %p2462_p7 = scmp.ge.s32.totalorder %s2998_s24, 1 }
   0xb   : > { %s3112_s30 = scalar_select %p297_p1, %s2994_s23, %s299_s28  }
   0xc   : > { %p3114_p5 = por %p310_p2, %p309_p0  ;;  %p3118_p6 = por %p316_p4, %p315_p3 }
   0xd   : > { %3617 = sst [smem:[#allocation6_spill]] %s3112_s30  ;;  %p382_p8 = scmp.lt.s32.totalorder %s2998_s24, 3 }
   0xf   : > { %p383_p9 = pnand %p2462_p7, %p382_p8 }
  0x10   : > { %p431_p10 = scmp.lt.s32.totalorder (!%p383_p9), %s3097_s25, 1  ;;  %s3620_s0 = sld [smem:[#allocation7_spill]] (!%p383_p9) }
  0x11   : > { %386 = sbr.rel (%p383_p9) target bundleno = 1219 (0x4c3), region = 68  ;;  %s2561_s20 = sshll.u32 (!%p383_p9), %s3097_s25, 7 }
  0x12   : > { %s2374_s16 = scalar_lea.hbm (!%p383_p9), %s3613_s12, %s2561_s20  ;;  %s3010_s30 = smov (!%p383_p9), [#allocation2]  }
  0x16   : > { %v449_v0 = vld [vmem:[%s3604_s3 + $0x18] sm:$0xff]  ;;  %v3000_v2 = vmov 0.0   ;;  %v448_v3 = vld [vmem:[%s3604_s3 + $0x10] sm:$0xff]  ;;  %s432_s29 = scalar_select %p431_p10, %s3097_s25, 1  ;;  %v447_v5 = vld [vmem:[%s3604_s3 + $0x8] sm:$0xff]  ;;  %vm457_vm0 = vcmask 261120  }
  0x17   : > { %v534_v1 = vld [vmem:[%s3606_s5 + $0x18] sm:$0xff]  ;;  %2653 = vmatprep.subr.mxu0 %v3000_v2  ;;  %2664 = vmatprep.subr.mxu1 %v3000_v2  ;;  %v533_v4 = vld [vmem:[%s3606_s5 + $0x10] sm:$0xff]  ;;  %v532_v6 = vld [vmem:[%s3606_s5 + $0x8] sm:$0xff]  ;;  %vm3001_vm1 = vmmov 0   ;;  %v3002_v53 = vmov 1   ;;  %v3003_v54 = vmov 0  }
  0x18   : > { %2654 = vmatpush3.msra.mxu0 %v449_v0  ;;  %2665 = vmatpush3.msra.mxu1 %v534_v1  ;;  %s3148_s19 = sshll.u32 %s432_s29, 3  ;;  %v446_v7 = vld [vmem:[%s3604_s3] sm:$0xff]  ;;  %v618_v11 = vld [vmem:[%s3608_s7 + $0x18] sm:$0xff]  ;;  %v617_v13 = vld [vmem:[%s3608_s7 + $0x10] sm:$0xff]  ;;  %vm1450_vm2 = vcmask 64512  }
  0x19   : > { %2655 = vmatprep.subr.mxu0 %v3000_v2  ;;  %2666 = vmatprep.subr.mxu1 %v3000_v2  ;;  %v531_v8 = vld [vmem:[%s3606_s5] sm:$0xff]  ;;  %s438_s18 = scalar_lea.vmem %s3602_s1, %s3148_s19  ;;  %s434_s23 = scalar_lea.vmem %s3620_s0, %s3148_s19  ;;  %v2476_v12 = vld [vmem:[%s3604_s3 + $0x38] sm:$0xff]  ;;  %v2475_v14 = vld [vmem:[%s3604_s3 + $0x30] sm:$0xff] }
  0x1a   : > { %2656 = vmatpush3.msra.mxu0 %v448_v3  ;;  %2667 = vmatpush3.msra.mxu1 %v533_v4  ;;  %v3168_v9 = vld [vmem:[%s438_s18] sm:$0xff]  ;;  %v616_v15 = vld [vmem:[%s3608_s7 + $0x8] sm:$0xff]  ;;  %s442_s18 = scalar_lea.vmem %s3603_s2, %s3148_s19  ;;  %v2483_v20 = vld [vmem:[%s3606_s5 + $0x38] sm:$0xff]  ;;  %s2942_s19 = sshll.u32 %s3010_s30, 4  ;;  %s2943_s19 = int_to_ptr.vmem [resolvable:$false] %s2942_s19 }
  0x1b   : > { %2657 = vmatprep.subr.mxu0 %v3000_v2  ;;  %2668 = vmatprep.subr.mxu1 %v3000_v2  ;;  %v3170_v10 = vld [vmem:[%s434_s23] sm:$0xff]  ;;  %v2474_v16 = vld [vmem:[%s3604_s3 + $0x28] sm:$0xff]  ;;  %v2490_v21 = vld [vmem:[%s3608_s7 + $0x38] sm:$0xff]  ;;  %s2944_s25 = scalar_lea.vmem %s2943_s19, 256 }
  0x1c   : > { %2658 = vmatpush3.msra.mxu0 %v447_v5  ;;  %2669 = vmatpush3.msra.mxu1 %v532_v6  ;;  %v615_v17 = vld [vmem:[%s3608_s7] sm:$0xff]  ;;  %v2482_v22 = vld [vmem:[%s3606_s5 + $0x30] sm:$0xff]  ;;  %v2481_v24 = vld [vmem:[%s3606_s5 + $0x28] sm:$0xff] }
  0x1d   : > { %2659 = vmatprep.subr.mxu0 %v3000_v2  ;;  %2670 = vmatprep.subr.mxu1 %v3000_v2  ;;  %v2473_v18 = vld [vmem:[%s3604_s3 + $0x20] sm:$0xff]  ;;  %v2489_v23 = vld [vmem:[%s3608_s7 + $0x30] sm:$0xff]  ;;  %v2488_v25 = vld [vmem:[%s3608_s7 + $0x28] sm:$0xff] }
  0x1e   : > { %2660 = vmatpush3.msra.mxu0 %v446_v7  ;;  %2671 = vmatpush3.msra.mxu1 %v531_v8  ;;  %v3216_v19 = vld [vmem:[%s442_s18] sm:$0xff]  ;;  %v2497_v28 = vld [vmem:[%s3604_s3 + $0x58] sm:$0xff]  ;;  %v2496_v30 = vld [vmem:[%s3604_s3 + $0x50] sm:$0xff]  ;;  %s428_s18 = sand.u32 1, %s2990_s22  }
  0x1f   : > { %2672 = vmatprep.mubr.msk.f32.mxu1 %vm3001_vm1, %v3000_v2  ;;  %2661 = vmatprep.mubr.msk.f32.mxu0 %vm3001_vm1, %v3000_v2  ;;  %v2480_v26 = vld [vmem:[%s3606_s5 + $0x20] sm:$0xff]  ;;  %v2504_v29 = vld [vmem:[%s3606_s5 + $0x58] sm:$0xff]  ;;  %v2503_v31 = vld [vmem:[%s3606_s5 + $0x50] sm:$0xff]  ;;  %s2463_s29 = sshll.u32 %s428_s18, 3  ;;  %s2363_s17 = scalar_lea.sflag [#allocation3], %s428_s18 }
  0x20   : > { %2673 = vmatmul.mubr.msk.f32.vlgmr.msra.gmra.mxu1 %vm457_vm0, %v3168_v9  ;;  %2675 = vmatprep.subr.mxu0 %v3000_v2  ;;  %v2487_v27 = vld [vmem:[%s3608_s7 + $0x20] sm:$0xff]  ;;  %v2495_v32 = vld [vmem:[%s3604_s3 + $0x48] sm:$0xff]  ;;  %v2511_v36 = vld [vmem:[%s3608_s7 + $0x58] sm:$0xff]  ;;  %s430_s26 = scalar_lea.vmem [#allocation2], %s2463_s29 }
  0x21   : > { %2686 = vmatprep.subr.mxu1 %v3000_v2  ;;  %2662 = vmatmul.mubr.msk.f32.vlgmr.msra.gmra.mxu0 %vm457_vm0, %v3170_v10  ;;  %v2502_v33 = vld [vmem:[%s3606_s5 + $0x48] sm:$0xff]  ;;  %v2494_v34 = vld [vmem:[%s3604_s3 + $0x40] sm:$0xff]  ;;  %v2518_v37 = vld [vmem:[%s3604_s3 + $0x78] sm:$0xff]  ;;  %s2376_s28 = sshll.u32 %s430_s26, 4  ;;  %s2377_s28 = int_to_ptr.vmem [resolvable:$true] %s2376_s28 }
  0x22   : > { %2676 = vmatpush3.msra.mxu0 %v618_v11  ;;  %2687 = vmatpush3.msra.mxu1 %v2476_v12  ;;  %v2501_v35 = vld [vmem:[%s3606_s5 + $0x40] sm:$0xff]  ;;  %v2510_v38 = vld [vmem:[%s3608_s7 + $0x50] sm:$0xff]  ;;  %v2509_v40 = vld [vmem:[%s3608_s7 + $0x48] sm:$0xff]  ;;  %s2938_s0 = scalar_lea.vmem %s2377_s28, 128  ;;  %p2945_p0 = scmp.lt.s32.totalorder %s2377_s28, %s2943_s19 }
  0x23   : > { %2677 = vmatprep.subr.mxu0 %v3000_v2  ;;  %2688 = vmatprep.subr.mxu1 %v3000_v2  ;;  %v2517_v39 = vld [vmem:[%s3604_s3 + $0x70] sm:$0xff]  ;;  %v2516_v41 = vld [vmem:[%s3604_s3 + $0x68] sm:$0xff]  ;;  %v2508_v42 = vld [vmem:[%s3608_s7 + $0x40] sm:$0xff]  ;;  %p2939_p11 = scmp.ne.s32.totalorder %s2377_s28, %s2938_s0  ;;  %p2946_p1 = scmp.lt.s32.totalorder %s2944_s25, %s2938_s0 }
  0x24   : > { %2678 = vmatpush3.msra.mxu0 %v617_v13  ;;  %2689 = vmatpush3.msra.mxu1 %v2475_v14  ;;  %v2515_v43 = vld [vmem:[%s3604_s3 + $0x60] sm:$0xff]  ;;  %v2525_v44 = vld [vmem:[%s3606_s5 + $0x78] sm:$0xff]  ;;  %v2524_v46 = vld [vmem:[%s3606_s5 + $0x70] sm:$0xff] }
  0x25   : > { %2679 = vmatprep.subr.mxu0 %v3000_v2  ;;  %2690 = vmatprep.subr.mxu1 %v3000_v2  ;;  %v2532_v45 = vld [vmem:[%s3608_s7 + $0x78] sm:$0xff]  ;;  %v2531_v47 = vld [vmem:[%s3608_s7 + $0x70] sm:$0xff]  ;;  %v2523_v48 = vld [vmem:[%s3606_s5 + $0x68] sm:$0xff]  ;;  %p2940_p12 = pnand %p2939_p11, %p3114_p5  ;;  %p2947_p2 = por %p2946_p1, %p2945_p0 }
  0x26   : > { %2680 = vmatpush3.msra.mxu0 %v616_v15  ;;  %2691 = vmatpush3.msra.mxu1 %v2474_v16  ;;  %v2530_v49 = vld [vmem:[%s3608_s7 + $0x68] sm:$0xff]  ;;  %v2522_v50 = vld [vmem:[%s3606_s5 + $0x60] sm:$0xff] }
  0x27   : > { %2681 = vmatprep.subr.mxu0 %v3000_v2  ;;  %2692 = vmatprep.subr.mxu1 %v3000_v2  ;;  %v2529_v51 = vld [vmem:[%s3608_s7 + $0x60] sm:$0xff]  ;;  %p2941_p13 = pneg %p2940_p12 }
  0x28   : > { %2682 = vmatpush3.msra.mxu0 %v615_v17  ;;  %2693 = vmatpush3.msra.mxu1 %v2473_v18  ;;  %v1560_v52 = vld [vmem:[%s3610_s9] sm:$0xff] }
  0x29   : > { %2694 = vmatprep.mubr.msk.f32.mxu1 %vm3001_vm1, %v3000_v2  ;;  %2683 = vmatprep.mubr.msk.f32.mxu0 %vm3001_vm1, %v3000_v2  ;;  %v2467_v55 = vld [vmem:[%s3605_s4] ss:$0 sm:$0xff]  ;;  %v2478_v62 = vld [vmem:[%s3605_s4 + $0x1] ss:$0 sm:$0xff]  ;;  %v2520_v17 = vld [vmem:[%s3605_s4 + $0x3] ss:$0 sm:$0xff]  ;;  %p2948_p3 = pnand %p2947_p2, %p2941_p13 }
  0x2a   : > { %2695 = vmatmul.mubr.msk.f32.vlgmr.msra.gmra.mxu1 %vm457_vm0, %v3170_v10  ;;  %2697 = vmatprep.subr.mxu0 %v3000_v2 }
  0x2b   : > { %2708 = vmatprep.subr.mxu1 %v3000_v2  ;;  %2684 = vmatmul.mubr.msk.f32.vlgmr.msra.gmra.mxu0 %vm457_vm0, %v3216_v19 }
  0x2c   : > { %2698 = vmatpush3.msra.mxu0 %v2483_v20  ;;  %2709 = vmatpush3.msra.mxu1 %v2490_v21 }
  0x2d   : > { %2699 = vmatprep.subr.mxu0 %v3000_v2  ;;  %2710 = vmatprep.subr.mxu1 %v3000_v2 }
  0x2e   : > { %2700 = vmatpush3.msra.mxu0 %v2482_v22  ;;  %2711 = vmatpush3.msra.mxu1 %v2489_v23 }
  0x2f   : > { %2701 = vmatprep.subr.mxu0 %v3000_v2  ;;  %2712 = vmatprep.subr.mxu1 %v3000_v2 }
  0x30   : > { %2702 = vmatpush3.msra.mxu0 %v2481_v24  ;;  %2713 = vmatpush3.msra.mxu1 %v2488_v25  ;;  %v2506_v24 = vld [vmem:[%s3607_s6 + $0x2] ss:$0 sm:$0xff] }
  0x31   : > { %2703 = vmatprep.subr.mxu0 %v3000_v2  ;;  %2714 = vmatprep.subr.mxu1 %v3000_v2  ;;  %v2513_v25 = vld [vmem:[%s3609_s8 + $0x2] ss:$0 sm:$0xff] }
  0x32   : > { %2704 = vmatpush3.msra.mxu0 %v2480_v26  ;;  %2715 = vmatpush3.msra.mxu1 %v2487_v27  ;;  %v2527_v26 = vld [vmem:[%s3607_s6 + $0x3] ss:$0 sm:$0xff] }
  0x33   : > { %2705 = vmatprep.mubr.msk.f32.mxu0 %vm3001_vm1, %v3000_v2  ;;  %2716 = vmatprep.mubr.msk.f32.mxu1 %vm3001_vm1, %v3000_v2  ;;  %v2534_v27 = vld [vmem:[%s3609_s8 + $0x3] ss:$0 sm:$0xff] }
  0x34   : > { %2719 = vmatprep.subr.mxu0 %v3000_v2  ;;  %2730 = vmatprep.subr.mxu1 %v3000_v2 }
  0x35   : > { %2706 = vmatmul.mubr.msk.f32.vlgmr.msra.gmra.mxu0 %vm457_vm0, %v3168_v9  ;;  %2717 = vmatmul.mubr.msk.f32.vlgmr.msra.gmra.mxu1 %vm457_vm0, %v3216_v19 }
  0x36   : > { %2720 = vmatpush3.msra.mxu0 %v2497_v28  ;;  %2731 = vmatpush3.msra.mxu1 %v2504_v29  ;;  %v2492_v28 = vld [vmem:[%s3609_s8 + $0x1] ss:$0 sm:$0xff] }
  0x37   : > { %2721 = vmatprep.subr.mxu0 %v3000_v2  ;;  %2732 = vmatprep.subr.mxu1 %v3000_v2 }
  0x38   : > { %2722 = vmatpush3.msra.mxu0 %v2496_v30  ;;  %2733 = vmatpush3.msra.mxu1 %v2503_v31 }
  0x39   : > { %2723 = vmatprep.subr.mxu0 %v3000_v2  ;;  %2734 = vmatprep.subr.mxu1 %v3000_v2 }
  0x3a   : > { %2724 = vmatpush3.msra.mxu0 %v2495_v32  ;;  %2735 = vmatpush3.msra.mxu1 %v2502_v33 }
  0x3b   : > { %2725 = vmatprep.subr.mxu0 %v3000_v2  ;;  %2736 = vmatprep.subr.mxu1 %v3000_v2 }
  0x3c   : > { %2726 = vmatpush3.msra.mxu0 %v2494_v34  ;;  %2737 = vmatpush3.msra.mxu1 %v2501_v35  ;;  %v2471_v35 = vld [vmem:[%s3609_s8] ss:$0 sm:$0xff] }
  0x3d   : > { %2727 = vmatprep.mubr.msk.f32.mxu0 %vm3001_vm1, %v3000_v2  ;;  %2738 = vmatprep.mubr.msk.f32.mxu1 %vm3001_vm1, %v3000_v2 }
  0x3e   : > { %2741 = vmatprep.subr.mxu0 %v3000_v2  ;;  %2752 = vmatprep.subr.mxu1 %v3000_v2 }
  0x3f   : > { %2728 = vmatmul.mubr.msk.f32.vlgmr.msra.gmra.mxu0 %vm457_vm0, %v3170_v10  ;;  %2739 = vmatmul.mubr.msk.f32.vlgmr.msra.gmra.mxu1 %vm457_vm0, %v3168_v9 }
  0x40   : > { %2742 = vmatpush3.msra.mxu0 %v2511_v36  ;;  %2753 = vmatpush3.msra.mxu1 %v2518_v37  ;;  %v2485_v36 = vld [vmem:[%s3607_s6 + $0x1] ss:$0 sm:$0xff] }
  0x41   : > { %2743 = vmatprep.subr.mxu0 %v3000_v2  ;;  %2754 = vmatprep.subr.mxu1 %v3000_v2 }
  0x42   : > { %2744 = vmatpush3.msra.mxu0 %v2510_v38  ;;  %2755 = vmatpush3.msra.mxu1 %v2517_v39 }
  0x43   : > { %2745 = vmatprep.subr.mxu0 %v3000_v2  ;;  %2756 = vmatprep.subr.mxu1 %v3000_v2 }
  0x44   : > { %2746 = vmatpush3.msra.mxu0 %v2509_v40  ;;  %2757 = vmatpush3.msra.mxu1 %v2516_v41 }
  0x45   : > { %2747 = vmatprep.subr.mxu0 %v3000_v2  ;;  %2758 = vmatprep.subr.mxu1 %v3000_v2 }
  0x46   : > { %2748 = vmatpush3.msra.mxu0 %v2508_v42  ;;  %2759 = vmatpush3.msra.mxu1 %v2515_v43  ;;  %v2469_v42 = vld [vmem:[%s3607_s6] ss:$0 sm:$0xff] }
  0x47   : > { %2749 = vmatprep.mubr.msk.f32.mxu0 %vm3001_vm1, %v3000_v2  ;;  %2760 = vmatprep.mubr.msk.f32.mxu1 %vm3001_vm1, %v3000_v2 }
  0x48   : > { %2763 = vmatprep.subr.mxu0 %v3000_v2  ;;  %2774 = vmatprep.subr.mxu1 %v3000_v2 }
  0x49   : > { %2750 = vmatmul.mubr.msk.f32.vlgmr.msra.gmra.mxu0 %vm457_vm0, %v3216_v19  ;;  %2761 = vmatmul.mubr.msk.f32.vlgmr.msra.gmra.mxu1 %vm457_vm0, %v3170_v10  ;;  %v2499_v10 = vld [vmem:[%s3605_s4 + $0x2] ss:$0 sm:$0xff] }
  0x4a   : > { %2764 = vmatpush3.msra.mxu0 %v2525_v44  ;;  %2775 = vmatpush3.msra.mxu1 %v2532_v45  ;;  %v1646_v44 = vlaneseq }
  0x4b   : > { %2765 = vmatprep.subr.mxu0 %v3000_v2  ;;  %2776 = vmatprep.subr.mxu1 %v3000_v2 }
  0x4c   : > { %2766 = vmatpush3.msra.mxu0 %v2524_v46  ;;  %2777 = vmatpush3.msra.mxu1 %v2531_v47  ;;  %v3450_v45 = vshrl.u32 %v1646_v44, 7  ;;  %v1652_v46 = vand.u32 127, %v1646_v44 }
  0x4d   : > { %2767 = vmatprep.subr.mxu0 %v3000_v2  ;;  %2778 = vmatprep.subr.mxu1 %v3000_v2 }
  0x4e   : > { %2768 = vmatpush3.msra.mxu0 %v2523_v48  ;;  %2779 = vmatpush3.msra.mxu1 %v2530_v49  ;;  %v1650_v47 = vadd.s32 24, %v3450_v45  ;;  %v1649_v48 = vadd.s32 16, %v3450_v45  ;;  %v3454_v49 = vshra.s32 %v1652_v46, 3 }
  0x4f   : > { %2769 = vmatprep.subr.mxu0 %v3000_v2  ;;  %2780 = vmatprep.subr.mxu1 %v3000_v2 }
  0x50   : > { %2770 = vmatpush3.msra.mxu0 %v2522_v50  ;;  %2771 = vmatprep.mubr.msk.f32.mxu0 %vm3001_vm1, %v3000_v2  ;;  %v3456_v50 = vand.u32 7, %v1652_v46 }
  0x51   : > { %2781 = vmatpush3.msra.mxu1 %v2529_v51  ;;  %2782 = vmatprep.mubr.msk.f32.mxu1 %vm3001_vm1, %v3000_v2  ;;  %v1656_v51 = vshra.s32 %v1650_v47, 3 }
  0x52   : > { %2772 = vmatmul.mubr.msk.f32.vlgmr.msra.gmra.mxu0 %vm457_vm0, %v3168_v9  ;;  %2783 = vmatmul.mubr.msk.f32.vlgmr.msra.gmra.mxu1 %vm457_vm0, %v3216_v19 }
  0x53   : > { %2799 = vmatprep.subr.mxu1 %v1560_v52  ;;  %2891 = vset.pattern.permute.xlu1 %v3002_v53  ;;  %vm3459_vm3 = vcmp.eq.s32.totalorder %v1656_v51, %v3454_v49 }
  0x54   : > { %2800 = vmatpush3.msra.mxu1 %v1560_v52  ;;  %2890 = vset.pattern.permute.xlu0 %v3003_v54  ;;  %v1665_v52 = vand.u32 7, %v1650_v47 }
  0xe0   : > { %v3394_v56 = vpop.f32.mrf.mxu1 }
  0xe1   : > { %v527_v57 = vpop.f32.mrf.mxu0  ;;  %v612_v43 = vadd.f32 %v2469_v42, %v3394_v56  ;;  %v1664_v56 = vand.u32 7, %v1649_v48  ;;  %v1653_v42 = vshra.s32 %v3450_v45, 3 }
  0xe2   : > { %v2674_v58 = vpop.f32.mrf.mxu1  ;;  %v528_v59 = vadd.f32 %v2467_v55, %v527_v57  ;;  %v1655_v55 = vshra.s32 %v1649_v48, 3 }
  0xe3   : > { %v2663_v60 = vpop.f32.mrf.mxu0  ;;  %v1670_v58 = vsub.s32 %v1665_v52, %v3456_v50  ;;  %vm3493_vm14 = vcmp.eq.s32.totalorder %v1653_v42, %v3454_v49 }
  0xe4   : > { %v1446_v61 = vmul.f32 0.35355338, %v528_v59  ;;  %vm3465_vm4 = vcmp.eq.s32.totalorder %v1655_v55, %v3454_v49  ;;  %v1669_v60 = vsub.s32 %v1664_v56, %v3456_v50 }
  0xe6   : > { %2793 = vmatprep.mubr.msk.f32.mxu0 %vm1450_vm2, %v1446_v61  ;;  %2801 = vmatprep.mubr.msk.f32.mxu1 %vm1450_vm2, %v1446_v61  ;;  %v1674_v61 = vsub.s32 7, %v1670_v58 }
  0xea   : > { %v778_v63 = vpop.f32.mrf.mxu1 }
  0xeb   : > { %v779_v0 = vadd.f32 %v2478_v62, %v778_v63  ;;  %v695_v1 = vpop.f32.mrf.mxu0  ;;  %v1673_v62 = vsub.s32 7, %v1669_v60  ;;  %v3472_v63 = vsel %vm3459_vm3, %v1674_v61, 4294967295 }
  0xec   : > { %v2696_v3 = vpop.f32.mrf.mxu1  ;;  %v696_v40 = vadd.f32 %v2471_v35, %v695_v1 }
  0xed   : > { %v1447_v4 = vmul.f32 0.35355338, %v779_v0  ;;  %v2685_v5 = vpop.f32.mrf.mxu0  ;;  %v3476_v0 = vsel %vm3465_vm4, %v1673_v62, 4294967295  ;;  %v3004_v3 = vmov 2  }
  0xee   : > { %v3006_v5 = vmov 4  }
  0xef   : > { %2802 = vmatmul.mubr.msk.f32.vlgmr.msra.gmra.mxu1 %vm1450_vm2, %v1447_v4 }
  0xf5   : > { %v944_v6 = vpop.f32.mrf.mxu1  ;;  %v861_v7 = vpop.f32.mrf.mxu0 }
  0xf6   : > { %v945_v39 = vadd.f32 %v2492_v28, %v944_v6  ;;  %v862_v41 = vadd.f32 %v2485_v36, %v861_v7  ;;  %v3007_v6 = vmov 6  }
  0xf7   : > { %v2718_v8 = vpop.f32.mrf.mxu1  ;;  %v2707_v9 = vpop.f32.mrf.mxu0 }
  0xf8   : > { %v3008_v8 = vmov 5   ;;  %v3009_v9 = vmov 7  }
  0xff   : > { %v1110_v11 = vpop.f32.mrf.mxu1  ;;  %v1027_v12 = vpop.f32.mrf.mxu0 }
 0x100   : > { %v1028_v13 = vadd.f32 %v2499_v10, %v1027_v12  ;;  %v1111_v31 = vadd.f32 %v2506_v24, %v1110_v11 }
 0x101   : > { %v2740_v14 = vpop.f32.mrf.mxu1  ;;  %v2729_v15 = vpop.f32.mrf.mxu0 }
 0x102   : > { %v1448_v16 = vmul.f32 0.35355338, %v1028_v13 }
 0x104   : > { %2804 = vmatprep.mubr.msk.f32.mxu1 %vm1450_vm2, %v1448_v16 }
 0x109   : > { %v1276_v18 = vpop.f32.mrf.mxu1  ;;  %v1193_v19 = vpop.f32.mrf.mxu0 }
 0x10a   : > { %v1277_v20 = vadd.f32 %v2520_v17, %v1276_v18  ;;  %v1194_v32 = vadd.f32 %v2513_v25, %v1193_v19 }
 0x10b   : > { %v2751_v21 = vpop.f32.mrf.mxu0  ;;  %v2762_v22 = vpop.f32.mrf.mxu1 }
 0x10c   : > { %v1449_v23 = vmul.f32 0.35355338, %v1277_v20 }
 0x10e   : > { %2805 = vmatmul.mubr.msk.f32.gmra.mxu1 %vm1450_vm2, %v1449_v23 }
 0x112   : > { %v1359_v29 = vpop.f32.mrf.mxu0  ;;  %v1442_v30 = vpop.f32.mrf.mxu1 }
 0x113   : > { %v1360_v33 = vadd.f32 %v2527_v26, %v1359_v29  ;;  %v1443_v34 = vadd.f32 %v2534_v27, %v1442_v30 }
 0x114   : > { %v2773_v37 = vpop.f32.mrf.mxu0  ;;  %v2784_v38 = vpop.f32.mrf.mxu1 }
 0x115   : > { %2785 = vmatprep.subr.msk.mxu0 %vm1450_vm2, %v1360_v33  ;;  %2807 = vmatprep.subr.mxu1 %v1443_v34 }
 0x116   : > { %2786 = vmatpush3.xpose.msk.msra.mxu0 %vm1450_vm2, %v1360_v33  ;;  %2808 = vmatpush3.msra.mxu1 %v1443_v34 }
 0x117   : > { %2809 = vmatprep.subr.mxu1 %v1194_v32  ;;  %2787 = vmatprep.subr.msk.mxu0 %vm1450_vm2, %v1111_v31 }
 0x118   : > { %2810 = vmatpush3.msra.mxu1 %v1194_v32  ;;  %v1662_v32 = vand.u32 7, %v3450_v45 }
 0x119   : > { %2811 = vmatprep.subr.mxu1 %v945_v39 }
 0x11a   : > { %2788 = vmatpush3.xpose.msk.msra.mxu0 %vm1450_vm2, %v1111_v31  ;;  %2812 = vmatpush3.msra.mxu1 %v945_v39  ;;  %v1667_v37 = vsub.s32 %v1662_v32, %v3456_v50 }
 0x11b   : > { %2813 = vmatprep.subr.mxu1 %v696_v40  ;;  %2789 = vmatprep.subr.msk.mxu0 %vm1450_vm2, %v862_v41 }
 0x11c   : > { %2814 = vmatpush3.msra.mxu1 %v696_v40  ;;  %v1671_v44 = vsub.s32 7, %v1667_v37 }
 0x11d   : > { %2821 = vmatprep.subr.mxu1 %v3000_v2 }
 0x11e   : > { %2790 = vmatpush3.xpose.msk.msra.mxu0 %vm1450_vm2, %v862_v41  ;;  %v1675_v51 = vsel %vm3493_vm14, %v1671_v44, 4294967295 }
 0x11f   : > { %2791 = vmatprep.subr.msk.mxu0 %vm1450_vm2, %v612_v43  ;;  %vm1683_vm15 = vcmp.eq.s32.totalorder %v1675_v51, 0 }
 0x122   : > { %2792 = vmatpush3.xpose.msk.msra.mxu0 %vm1450_vm2, %v612_v43 }
 0x123   : > { %2826 = vmatprep.subr.mxu0 %v3000_v2 }
 0x125   : > { %2794 = vmatmul.mubr.msk.f32.vlgmr.msra.gmra.mxu0 %vm1450_vm2, %v1447_v4  ;;  %v3005_v4 = vmov 3  }
 0x126   : > { %2796 = vmatprep.mubr.msk.f32.mxu0 %vm1450_vm2, %v1448_v16 }
 0x129   : > { %2797 = vmatmul.mubr.msk.f32.gmra.mxu0 %vm1450_vm2, %v1449_v23 }
 0x12a   : > { %2828 = vmatprep.mubr.msk.f32.mxu0 %vm3001_vm1, %v3000_v2 }
 0x1af   : > { %v2803_v1 = vpop.f32.mrf.mxu1 }
 0x1b0   : > { %1724 = vperm.xlu1 %2891, %v2803_v1   ;;  %1694 = vperm.xlu0 %2890, %v2803_v1  }
 0x1b1   : > { %v1627_v7 = vpop.f32.mrf.mxu1 }
 0x1b4   : > { %2892 = vset.pattern.permute.xlu1 %v3004_v3  ;;  %2893 = vset.pattern.permute.xlu0 %v3005_v4 }
 0x1b5   : > { %1752 = vperm.xlu1 %2892, %v2803_v1   ;;  %1780 = vperm.xlu0 %2893, %v2803_v1  }
 0x1b9   : > { %2894 = vset.pattern.permute.xlu1 %v3006_v5  ;;  %2896 = vset.pattern.permute.xlu0 %v3007_v6 }
 0x1ba   : > { %1808 = vperm.xlu1 %2894, %v2803_v1   ;;  %1864 = vperm.xlu0 %2896, %v2803_v1  }
 0x1be   : > { %2895 = vset.pattern.permute.xlu1 %v3008_v8  ;;  %2898 = vset.pattern.permute.xlu0 %v3003_v54 }
 0x1bf   : > { %1836 = vperm.xlu1 %2895, %v2803_v1   ;;  %1689 = vperm.xlu0 %2898, %v1627_v7  }
 0x1c3   : > { %2897 = vset.pattern.permute.xlu1 %v3009_v9  ;;  %2903 = vset.pattern.permute.xlu0 %v3008_v8 }
 0x1c4   : > { %1892 = vperm.xlu1 %2897, %v2803_v1   ;;  %1832 = vperm.xlu0 %2903, %v1627_v7  }
 0x1c8   : > { %2899 = vset.pattern.permute.xlu1 %v3002_v53  ;;  %2906 = vset.pattern.permute.xlu0 %v3003_v54 }
 0x1c9   : > { %1720 = vperm.xlu1 %2899, %v1627_v7  }
 0x1cd   : > { %2900 = vset.pattern.permute.xlu1 %v3004_v3 }
 0x1ce   : > { %v2806_v10 = vpop.f32.mrf.mxu1  ;;  %1748 = vperm.xlu1 %2900, %v1627_v7  }
 0x1cf   : > { %1704 = vperm.xlu0 %2906, %v2806_v10  }
 0x1d0   : > { %v1637_v11 = vpop.f32.mrf.mxu1 }
 0x1d2   : > { %2901 = vset.pattern.permute.xlu1 %v3005_v4 }
 0x1d3   : > { %2908 = vset.pattern.permute.xlu0 %v3004_v3  ;;  %1776 = vperm.xlu1 %2901, %v1627_v7  }
 0x1d4   : > { %1760 = vperm.xlu0 %2908, %v2806_v10  }
 0x1d7   : > { %2902 = vset.pattern.permute.xlu1 %v3006_v5 }
 0x1d8   : > { %2911 = vset.pattern.permute.xlu0 %v3008_v8  ;;  %1804 = vperm.xlu1 %2902, %v1627_v7  }
 0x1d9   : > { %1844 = vperm.xlu0 %2911, %v2806_v10  }
 0x1dc   : > { %2904 = vset.pattern.permute.xlu1 %v3007_v6 }
 0x1dd   : > { %2912 = vset.pattern.permute.xlu0 %v3003_v54  ;;  %1860 = vperm.xlu1 %2904, %v1627_v7  }
 0x1de   : > { %1699 = vperm.xlu0 %2912, %v1637_v11  }
 0x1e1   : > { %2905 = vset.pattern.permute.xlu1 %v3009_v9 }
 0x1e2   : > { %2913 = vset.pattern.permute.xlu0 %v3002_v53  ;;  %1888 = vperm.xlu1 %2905, %v1627_v7  }
 0x1e3   : > { %1728 = vperm.xlu0 %2913, %v1637_v11  }
 0x1e5   : > { %v2795_v16 = vpop.f32.mrf.mxu0 }
 0x1e6   : > { %2907 = vset.pattern.permute.xlu1 %v3002_v53  ;;  %v1648_v53 = vadd.s32 8, %v3450_v45 }
 0x1e7   : > { %2916 = vset.pattern.permute.xlu0 %v3006_v5  ;;  %1732 = vperm.xlu1 %2907, %v2806_v10   ;;  %v1541_v45 = vpop.f32.mrf.mxu0 }
 0x1e8   : > { %1812 = vperm.xlu0 %2916, %v1637_v11   ;;  %v1663_v54 = vand.u32 7, %v1648_v53  ;;  %v1654_v13 = vshra.s32 %v1648_v53, 3  ;;  %v1679_v1 = vsel %vm3493_vm14, %v1541_v45, -1e+30  ;;  %vm1718_vm14 = vcmp.eq.s32.totalorder %v3472_v63, 1 }
 0x1e9   : > { %v2798_v58 = vpop.f32.mrf.mxu0 }
 0x1ea   : > { %v1668_v12 = vsub.s32 %v1663_v54, %v3456_v50  ;;  %vm1659_vm5 = vcmp.eq.s32.totalorder %v1654_v13, %v3454_v49  ;;  %v1682_v61 = vsel %vm3459_vm3, %v2798_v58, -1e+30  ;;  %vm1827_vm3 = vcmp.eq.s32.totalorder %v1675_v51, 5 }
 0x1eb   : > { %2909 = vset.pattern.permute.xlu1 %v3005_v4  ;;  %v1680_v19 = vsel %vm1659_vm5, %v2795_v16, -1e+30 }
 0x1ec   : > { %2917 = vset.pattern.permute.xlu0 %v3007_v6  ;;  %1788 = vperm.xlu1 %2909, %v2806_v10   ;;  %v1672_v14 = vsub.s32 7, %v1668_v12 }
 0x1ed   : > { %1872 = vperm.xlu0 %2917, %v2806_v10  }
 0x1ee   : > { %v1676_v15 = vsel %vm1659_vm5, %v1672_v14, 4294967295  ;;  %vm1686_vm5 = vcmp.eq.s32.totalorder %v3472_v63, 0  ;;  %v1551_v14 = vpop.f32.mrf.mxu0 }
 0x1ef   : > { %vm1684_vm6 = vcmp.eq.s32.totalorder %v1676_v15, 0  ;;  %vm1716_vm7 = vcmp.eq.s32.totalorder %v1676_v15, 1  ;;  %vm1744_vm8 = vcmp.eq.s32.totalorder %v1676_v15, 2  ;;  %vm1772_vm9 = vcmp.eq.s32.totalorder %v1676_v15, 3 }
 0x1f0   : > { %2910 = vset.pattern.permute.xlu1 %v3006_v5  ;;  %vm1800_vm10 = vcmp.eq.s32.totalorder %v1676_v15, 4  ;;  %vm1828_vm11 = vcmp.eq.s32.totalorder %v1676_v15, 5  ;;  %vm1856_vm12 = vcmp.eq.s32.totalorder %v1676_v15, 6  ;;  %vm1884_vm13 = vcmp.eq.s32.totalorder %v1676_v15, 7 }
 0x1f1   : > { %1816 = vperm.xlu1 %2910, %v2806_v10   ;;  %2921 = vset.pattern.permute.xlu0 %v3009_v9 }
 0x1f5   : > { %2914 = vset.pattern.permute.xlu1 %v3004_v3 }
 0x1f6   : > { %1756 = vperm.xlu1 %2914, %v1637_v11  }
 0x1fa   : > { %2915 = vset.pattern.permute.xlu1 %v3005_v4 }
 0x1fb   : > { %1784 = vperm.xlu1 %2915, %v1637_v11  }
 0x1ff   : > { %2918 = vset.pattern.permute.xlu1 %v3008_v8 }
 0x200   : > { %1840 = vperm.xlu1 %2918, %v1637_v11  }
 0x204   : > { %2919 = vset.pattern.permute.xlu1 %v3007_v6 }
 0x205   : > { %1868 = vperm.xlu1 %2919, %v1637_v11  }
 0x209   : > { %2920 = vset.pattern.permute.xlu1 %v3009_v9 }
 0x20a   : > { %1896 = vperm.xlu1 %2920, %v1637_v11  }
 0x20e   : > { %1900 = vperm.xlu1 %2920, %v2806_v10  }
 0x22b   : > { %v1725_v17 = vpop.permute.xlu1 %1724  ;;  %v1695_v18 = vpop.permute.xlu0 %1694 }
 0x22c   : > { %v1708_v20 = vsel %vm1684_vm6, %v1695_v18, 0.0  ;;  %v1736_v22 = vsel %vm1716_vm7, %v1725_v17, 0.0  ;;  %vm1715_vm6 = vcmp.eq.s32.totalorder %v1675_v51, 1  ;;  %vm1743_vm7 = vcmp.eq.s32.totalorder %v1675_v51, 2 }
 0x22d   : > { %v1712_v21 = vadd.f32 %v1708_v20, %v1680_v19  ;;  %v1681_v19 = vsel %vm3465_vm4, %v1551_v14, -1e+30  ;;  %vm1746_vm4 = vcmp.eq.s32.totalorder %v3472_v63, 2 }
 0x22f   : > { %v1740_v23 = vadd.f32 %v1736_v22, %v1712_v21 }
 0x230   : > { %v1753_v24 = vpop.permute.xlu1 %1752  ;;  %v1781_v27 = vpop.permute.xlu0 %1780 }
 0x231   : > { %v1764_v25 = vsel %vm1744_vm8, %v1753_v24, 0.0  ;;  %v1792_v28 = vsel %vm1772_vm9, %v1781_v27, 0.0  ;;  %vm1771_vm8 = vcmp.eq.s32.totalorder %v1675_v51, 3  ;;  %vm1799_vm9 = vcmp.eq.s32.totalorder %v1675_v51, 4 }
 0x232   : > { %v1768_v26 = vadd.f32 %v1764_v25, %v1740_v23 }
 0x234   : > { %v1796_v30 = vadd.f32 %v1792_v28, %v1768_v26 }
 0x235   : > { %v1809_v29 = vpop.permute.xlu1 %1808  ;;  %v1865_v33 = vpop.permute.xlu0 %1864 }
 0x236   : > { %v1820_v31 = vsel %vm1800_vm10, %v1809_v29, 0.0  ;;  %v1876_v39 = vsel %vm1856_vm12, %v1865_v33, 0.0  ;;  %vm1685_vm10 = vcmp.eq.s32.totalorder %v3476_v0, 0  ;;  %vm1883_vm12 = vcmp.eq.s32.totalorder %v1675_v51, 7 }
 0x237   : > { %v1824_v34 = vadd.f32 %v1820_v31, %v1796_v30 }
 0x23a   : > { %v1837_v35 = vpop.permute.xlu1 %1836  ;;  %v1690_v40 = vpop.permute.xlu0 %1689 }
 0x23b   : > { %v1848_v36 = vsel %vm1828_vm11, %v1837_v35, 0.0  ;;  %v1707_v49 = vsel %vm1683_vm15, %v1690_v40, 0.0  ;;  %vm1855_vm11 = vcmp.eq.s32.totalorder %v1675_v51, 6  ;;  %vm1774_vm15 = vcmp.eq.s32.totalorder %v3472_v63, 3 }
 0x23c   : > { %v1852_v38 = vadd.f32 %v1848_v36, %v1824_v34  ;;  %v1711_v5 = vadd.f32 %v1707_v49, %v1679_v1 }
 0x23e   : > { %v1880_v41 = vadd.f32 %v1876_v39, %v1852_v38 }
 0x23f   : > { %v1893_v43 = vpop.permute.xlu1 %1892  ;;  %v1833_v52 = vpop.permute.xlu0 %1832 }
 0x240   : > { %v1904_v46 = vsel %vm1884_vm13, %v1893_v43, 0.0  ;;  %v1847_v15 = vsel %vm1827_vm3, %v1833_v52, 0.0  ;;  %vm1717_vm13 = vcmp.eq.s32.totalorder %v3476_v0, 1  ;;  %vm1801_vm3 = vcmp.eq.s32.totalorder %v3476_v0, 4 }
 0x241   : > { %v3490_v47 = vadd.f32 %v1904_v46, %v1880_v41 }
 0x243   : > { %v1914_v50 = vsel %vm457_vm0, %v3490_v47, -inf }
 0x244   : > { %v1721_v55 = vpop.permute.xlu1 %1720  ;;  %1915 = vmax.xlane.f32.xlu1 %v1914_v50 }
 0x245   : > { %v1735_v3 = vsel %vm1715_vm6, %v1721_v55, 0.0  ;;  %vm1830_vm6 = vcmp.eq.s32.totalorder %v3472_v63, 5 }
 0x246   : > { %v1739_v8 = vadd.f32 %v1735_v3, %v1711_v5 }
 0x249   : > { %v1749_v56 = vpop.permute.xlu1 %1748 }
 0x24a   : > { %v1705_v60 = vpop.permute.xlu0 %1704  ;;  %v1763_v6 = vsel %vm1743_vm7, %v1749_v56, 0.0  ;;  %vm1858_vm7 = vcmp.eq.s32.totalorder %v3472_v63, 6 }
 0x24b   : > { %v1710_v62 = vsel %vm1686_vm5, %v1705_v60, 0.0  ;;  %v1767_v11 = vadd.f32 %v1763_v6, %v1739_v8  ;;  %vm1802_vm5 = vcmp.eq.s32.totalorder %v3472_v63, 4 }
 0x24c   : > { %v1714_v4 = vadd.f32 %v1710_v62, %v1682_v61 }
 0x24e   : > { %v1777_v7 = vpop.permute.xlu1 %1776 }
 0x24f   : > { %v1761_v9 = vpop.permute.xlu0 %1760  ;;  %v1791_v10 = vsel %vm1771_vm8, %v1777_v7, 0.0  ;;  %vm1745_vm8 = vcmp.eq.s32.totalorder %v3476_v0, 2 }
 0x250   : > { %v1795_v53 = vadd.f32 %v1791_v10, %v1767_v11  ;;  %v1766_v33 = vsel %vm1746_vm4, %v1761_v9, 0.0 }
 0x253   : > { %v1805_v54 = vpop.permute.xlu1 %1804 }
 0x254   : > { %v1845_v57 = vpop.permute.xlu0 %1844  ;;  %v1819_v12 = vsel %vm1799_vm9, %v1805_v54, 0.0  ;;  %vm1773_vm9 = vcmp.eq.s32.totalorder %v3476_v0, 3 }
 0x255   : > { %v1823_v13 = vadd.f32 %v1819_v12, %v1795_v53  ;;  %v1850_v43 = vsel %vm1830_vm6, %v1845_v57, 0.0 }
 0x257   : > { %v1851_v18 = vadd.f32 %v1847_v15, %v1823_v13 }
 0x258   : > { %v1861_v16 = vpop.permute.xlu1 %1860 }
 0x259   : > { %v1700_v17 = vpop.permute.xlu0 %1699  ;;  %v1875_v21 = vsel %vm1855_vm11, %v1861_v16, 0.0  ;;  %vm1857_vm11 = vcmp.eq.s32.totalorder %v3476_v0, 6 }
 0x25a   : > { %v1709_v20 = vsel %vm1685_vm10, %v1700_v17, 0.0  ;;  %v1879_v23 = vadd.f32 %v1875_v21, %v1851_v18  ;;  %vm1829_vm10 = vcmp.eq.s32.totalorder %v3476_v0, 5 }
 0x25b   : > { %v1713_v22 = vadd.f32 %v1709_v20, %v1681_v19 }
 0x25d   : > { %v1889_v24 = vpop.permute.xlu1 %1888 }
 0x25e   : > { %v1729_v25 = vpop.permute.xlu0 %1728  ;;  %v1903_v26 = vsel %vm1883_vm12, %v1889_v24, 0.0  ;;  %vm1885_vm12 = vcmp.eq.s32.totalorder %v3476_v0, 7 }
 0x25f   : > { %v1737_v27 = vsel %vm1717_vm13, %v1729_v25, 0.0  ;;  %v3510_v28 = vadd.f32 %v1903_v26, %v1879_v23  ;;  %vm1886_vm13 = vcmp.eq.s32.totalorder %v3472_v63, 7 }
 0x260   : > { %v1741_v29 = vadd.f32 %v1737_v27, %v1713_v22  ;;  %v2552_v27 = vld [vmem:[%s3611_s10 + $0x8] sm:$0xff] }
 0x261   : > { %v1911_v59 = vsel %vm457_vm0, %v3510_v28, -inf }
 0x262   : > { %v1733_v30 = vpop.permute.xlu1 %1732  ;;  %1912 = vmax.xlane.f32.xlu0 %v1911_v59 }
 0x263   : > { %v1738_v31 = vsel %vm1718_vm14, %v1733_v30, 0.0  ;;  %v1813_v36 = vpop.permute.xlu0 %1812 }
 0x264   : > { %v1742_v32 = vadd.f32 %v1738_v31, %v1714_v4  ;;  %v1821_v58 = vsel %vm1801_vm3, %v1813_v36, 0.0 }
 0x266   : > { %v1770_v34 = vadd.f32 %v1766_v33, %v1742_v32  ;;  %v2555_v33 = vld [vmem:[%s3611_s10 + $0x10] sm:$0xff] }
 0x267   : > { %v1789_v35 = vpop.permute.xlu1 %1788 }
 0x268   : > { %v1794_v37 = vsel %vm1774_vm15, %v1789_v35, 0.0  ;;  %v1873_v41 = vpop.permute.xlu0 %1872 }
 0x269   : > { %v1798_v38 = vadd.f32 %v1794_v37, %v1770_v34  ;;  %v1878_v46 = vsel %vm1858_vm7, %v1873_v41, 0.0  ;;  %v2557_v37 = vld [vmem:[%s3611_s10 + $0x18] sm:$0xff] }
 0x26c   : > { %v1817_v39 = vpop.permute.xlu1 %1816 }
 0x26d   : > { %v1822_v40 = vsel %vm1802_vm5, %v1817_v39, 0.0 }
 0x26e   : > { %v1826_v42 = vadd.f32 %v1822_v40, %v1798_v38 }
 0x270   : > { %v1854_v44 = vadd.f32 %v1850_v43, %v1826_v42 }
 0x271   : > { %v1757_v48 = vpop.permute.xlu1 %1756 }
 0x272   : > { %v1765_v50 = vsel %vm1745_vm8, %v1757_v48, 0.0  ;;  %v1882_v51 = vadd.f32 %v1878_v46, %v1854_v44 }
 0x273   : > { %v1769_v52 = vadd.f32 %v1765_v50, %v1741_v29 }
 0x276   : > { %v1785_v55 = vpop.permute.xlu1 %1784 }
 0x277   : > { %v1793_v45 = vsel %vm1773_vm9, %v1785_v55, 0.0 }
 0x278   : > { %v1797_v56 = vadd.f32 %v1793_v45, %v1769_v52 }
 0x27a   : > { %v1825_v49 = vadd.f32 %v1821_v58, %v1797_v56 }
 0x27b   : > { %v1841_v60 = vpop.permute.xlu1 %1840 }
 0x27c   : > { %v1849_v61 = vsel %vm1829_vm10, %v1841_v60, 0.0 }
 0x27d   : > { %v1853_v62 = vadd.f32 %v1849_v61, %v1825_v49  ;;  %v2559_v49 = vld [vmem:[%s3612_s11] ss:$0 sm:$0xff] }
 0x280   : > { %v1869_v1 = vpop.permute.xlu1 %1868 }
 0x281   : > { %v1877_v3 = vsel %vm1857_vm11, %v1869_v1, 0.0 }
 0x282   : > { %v1881_v4 = vadd.f32 %v1877_v3, %v1853_v62 }
 0x285   : > { %v1897_v5 = vpop.permute.xlu1 %1896 }
 0x286   : > { %v1905_v6 = vsel %vm1885_vm12, %v1897_v5, 0.0 }
 0x287   : > { %v1909_v7 = vadd.f32 %v1905_v6, %v1881_v4 }
 0x289   : > { %v1901_v8 = vpop.permute.xlu1 %1900  ;;  %v1917_v9 = vsel %vm457_vm0, %v1909_v7, -inf }
 0x28a   : > { %v1906_v10 = vsel %vm1886_vm13, %v1901_v8, 0.0  ;;  %1918 = vmax.xlane.f32.xlu0 %v1917_v9 }
 0x28b   : > { %v1910_v11 = vadd.f32 %v1906_v10, %v1882_v51 }
 0x28d   : > { %v1920_v53 = vsel %vm457_vm0, %v1910_v11, -inf }
 0x28e   : > { %1921 = vmax.xlane.f32.xlu0 %v1920_v53 }
 0x2cd   : > { %v1916_v54 = vpop.xlane.xlu1 %1915 }
 0x2ce   : > { %v1924_v57 = vsub.f32 %v3490_v47, %v1916_v54 }
 0x2d0   : > { %v1929_v12 = vmul.f32 1.442695, %v1924_v57 }
 0x2d2   : > { %2922 = vpow2.f32 %v1929_v12 }
 0x2df   : > { %v2923_v0 = vpop.eup %2922 }
 0x2e0   : > { %v1938_v13 = vsel %vm457_vm0, %v2923_v0, 0.0 }
 0x2e1   : > { %1939 = vadd.xlane.f32.xlu1 %v1938_v13 }
 0x2eb   : > { %v1913_v14 = vpop.xlane.xlu0 %1912 }
 0x2ec   : > { %v1923_v63 = vsub.f32 %v3510_v28, %v1913_v14  ;;  %v2052_v28 = vld [vmem:[%s3611_s10] sm:$0xff] }
 0x2ed   : > { %2827 = vmatpush3.msra.mxu0 %v2052_v28 }
 0x2ee   : > { %v1927_v15 = vmul.f32 1.442695, %v1923_v63  ;;  %2836 = vmatprep.subr.mxu0 %v3000_v2 }
 0x2f0   : > { %2924 = vpow2.f32 %v1927_v15 }
 0x2fd   : > { %v2925_v16 = vpop.eup %2924 }
 0x2fe   : > { %2815 = vmatprep.mubr.msk.f32.mxu1 %vm457_vm0, %v2925_v16  ;;  %v1935_v17 = vsel %vm457_vm0, %v2925_v16, 0.0 }
 0x2ff   : > { %2816 = vmatmul.mubr.msk.f32.vlgmr.msra.gmra.mxu1 %vm457_vm0, %v2923_v0  ;;  %1936 = vadd.xlane.f32.xlu0 %v1935_v17 }
 0x300   : > { %2822 = vmatpush3.msra.mxu1 %v2552_v27 }
 0x301   : > { %2831 = vmatprep.subr.mxu1 %v3000_v2 }
 0x313   : > { %v1919_v47 = vpop.xlane.xlu0 %1918 }
 0x314   : > { %v1925_v18 = vsub.f32 %v1909_v7, %v1919_v47 }
 0x316   : > { %v1931_v19 = vmul.f32 1.442695, %v1925_v18 }
 0x317   : > { %v1922_v20 = vpop.xlane.xlu0 %1921 }
 0x318   : > { %2926 = vpow2.f32 %v1931_v19  ;;  %v1926_v21 = vsub.f32 %v1910_v11, %v1922_v20 }
 0x31a   : > { %v1933_v22 = vmul.f32 1.442695, %v1926_v21 }
 0x31c   : > { %2928 = vpow2.f32 %v1933_v22 }
 0x325   : > { %v2927_v23 = vpop.eup %2926 }
 0x326   : > { %2818 = vmatprep.mubr.msk.f32.mxu1 %vm457_vm0, %v2927_v23  ;;  %v1941_v24 = vsel %vm457_vm0, %v2927_v23, 0.0 }
 0x327   : > { %1942 = vadd.xlane.f32.xlu1 %v1941_v24 }
 0x329   : > { %v2929_v25 = vpop.eup %2928 }
 0x32a   : > { %2819 = vmatmul.mubr.msk.f32.gmra.mxu1 %vm457_vm0, %v2929_v25  ;;  %v1944_v26 = vsel %vm457_vm0, %v2929_v25, 0.0 }
 0x32b   : > { %1945 = vadd.xlane.f32.xlu0 %v1944_v26  ;;  %2823 = vmatprep.mubr.msk.f32.mxu1 %vm3001_vm1, %v3000_v2 }
 0x36a   : > { %v1940_v29 = vpop.xlane.xlu1 %1939 }
 0x36b   : > { %2930 = vrcp.f32 %v1940_v29 }
 0x378   : > { %v2931_v30 = vpop.eup %2930 }
 0x388   : > { %v1937_v59 = vpop.xlane.xlu0 %1936 }
 0x389   : > { %2932 = vrcp.f32 %v1937_v59 }
 0x396   : > { %v2933_v34 = vpop.eup %2932 }
 0x3b0   : > { %v1943_v39 = vpop.xlane.xlu1 %1942 }
 0x3b4   : > { %v1946_v38 = vpop.xlane.xlu0 %1945 }
 0x3b5   : > { %2934 = vrcp.f32 %v1946_v38 }
 0x3b6   : > { %2936 = vrcp.f32 %v1943_v39 }
 0x3bf   : > { %v2817_v31 = vpop.f32.mrf.mxu1 }
 0x3c0   : > { %v2049_v32 = vmul.f32 %v2931_v30, %v2817_v31 }
 0x3c1   : > { %v2025_v35 = vpop.f32.mrf.mxu1 }
 0x3c2   : > { %v2048_v36 = vmul.f32 %v2933_v34, %v2025_v35  ;;  %2824 = vmatmul.mubr.msk.f32.vlgmr.msra.gmra.mxu1 %vm1450_vm2, %v2049_v32  ;;  %v2935_v40 = vpop.eup %2934 }
 0x3c3   : > { %2832 = vmatpush3.msra.mxu1 %v2555_v33  ;;  %2833 = vmatprep.mubr.msk.f32.mxu1 %vm3001_vm1, %v3000_v2  ;;  %v2937_v43 = vpop.eup %2936 }
 0x3c4   : > { %2829 = vmatmul.mubr.msk.f32.vlgmr.msra.gmra.mxu0 %vm1450_vm2, %v2048_v36 }
 0x3c5   : > { %2837 = vmatpush3.msra.mxu0 %v2557_v37  ;;  %2838 = vmatprep.mubr.msk.f32.mxu0 %vm3001_vm1, %v3000_v2 }
 0x3ea   : > { %v2820_v41 = vpop.f32.mrf.mxu1 }
 0x3eb   : > { %v2051_v42 = vmul.f32 %v2935_v40, %v2820_v41 }
 0x3ec   : > { %v2035_v44 = vpop.f32.mrf.mxu1 }
 0x3ed   : > { %v2050_v46 = vmul.f32 %v2937_v43, %v2035_v44  ;;  %2839 = vmatmul.mubr.msk.f32.vlgmr.msra.gmra.mxu0 %vm1450_vm2, %v2051_v42 }
 0x3ef   : > { %2834 = vmatmul.mubr.msk.f32.vlgmr.msra.gmra.mxu1 %vm1450_vm2, %v2050_v46 }
 0x482   : > { %v2124_v48 = vpop.f32.mrf.mxu1 }
 0x484   : > { %v2825_v50 = vpop.f32.mrf.mxu1  ;;  %v2197_v51 = vpop.f32.mrf.mxu0 }
 0x485   : > { %v2198_v55 = vadd.f32 %v2197_v51, %v2124_v48 }
 0x486   : > { %v2830_v2 = vpop.f32.mrf.mxu0 }
 0x4ad   : > { %v2348_v52 = vpop.f32.mrf.mxu0 }
 0x4af   : > { %v2272_v45 = vpop.f32.mrf.mxu1  ;;  %v2840_v56 = vpop.f32.mrf.mxu0 }
 0x4b0   : > { %v2276_v58 = vadd.f32 %v2272_v45, %v2198_v55 }
 0x4b1   : > { %v2835_v60 = vpop.f32.mrf.mxu1 }
 0x4b2   : > { %v2352_v61 = vadd.f32 %v2348_v52, %v2276_v58 }
 0x4b4   : > { %v2360_v62 = vadd.f32 %v2559_v49, %v2352_v61 }
 0x4b6   : > { %2361 = vst.msk [vmem:[%s430_s26] sm:$0xff] %vm457_vm0, %v2360_v62 }
 0x4b7   : > { %2951 = shalt.err (!%p2948_p3)
}
 0x4b8   : > { %s2952_s29 = scalar_lea.hbm %s2374_s16, 128  ;;  %s2956_s26 = scalar_lea.hbm %s3613_s12, 256 }
 0x4b9   : > { %p2953_p4 = scmp.ne.s32.totalorder %s2374_s16, %s2952_s29  ;;  %p2957_p9 = scmp.lt.s32.totalorder %s2374_s16, %s3613_s12 }
 0x4ba   : > { %p2958_p10 = scmp.lt.s32.totalorder %s2956_s26, %s2952_s29 }
 0x4bb   : > { %p2954_p7 = pnand %p2953_p4, %p3114_p5 }
 0x4bc   : > { %p2959_p11 = por %p2958_p10, %p2957_p9 }
 0x4bd   : > { %p2955_p8 = pneg %p2954_p7 }
 0x4bf   : > { %p2960_p12 = pnand %p2959_p11, %p2955_p8 }
 0x4c1   : > { %2963 = shalt.err (!%p2960_p12)
}
 0x4c2   : > { %2841 = dma.vmem_to_hbm [thread:$0]  (%p3114_p5), %s2377_s28, 128, %s2374_s16, %s2363_s17  }
 0x4c3 PF: > { %p2847_p13 = scmp.ge.s32.totalorder %s2998_s24, 2  ;;  %s2388_s0 = sand.u32 1, %s2986_s21  }
 0x4c4   : > { %s2389_s30 = scalar_lea.sflag [#allocation3], %s2388_s0 }
 0x4c5   : > { %p2844_p0 = pnand %p2847_p13, %p3118_p6 }
 0x4c7   : > { %p2845_p1 = pneg %p2844_p0 }
 0x4c9   : > { %2981 = dma.done.wait (%p2845_p1), %s2389_s30, 128  }
 0x4ca   : > { %2983 = vsyncadd (%p2845_p1), %s2389_s30, 4294967168  ;;  %s3627_s19 = sld [smem:[#allocation5_spill]]  ;;  %p22_p2 = scmp.ge.s32.totalorder %s3101_s27, 4  }
 0x4cb   : > { %s3628_s23 = sld [smem:[#allocation6_spill]]  ;;  %s3629_s21 = smov %s2990_s22 }
 0x4cc   : > { %s3631_s24 = smov %s3101_s27  ;;  %24 = sbr.rel (!%p22_p2) target bundleno = 5 (0x5), region = 130 }
 0x4d0   : > { %s3630_s22 = smov %s3627_s19 }
 0x4d1   :  { %2394 = vsyncpa [#allocation3], 1 }
 0x4d2   :  { %2396 = vsyncpa [#allocation3 + $0x1], 1 }

</bundles_post_ra>
